<compile_context>
chip_gen: v5e
topology: v5e:2x2
jax: 0.10.0
libtpu: 0.0.40
codegen_flags: <defaults>
</compile_context>

<pallas_src>
from functools import partial

import jax
import jax.numpy as jnp
from jax import lax
from jax.experimental import pallas as pl
from jax.experimental.pallas import tpu as pltpu

BN_EPS = 1e-5


def _gelu(x):
    # tanh-approximate GELU; |exact - approx| <~ 1e-3, well inside the
    # mixed-precision tolerance, and rides the EUP instead of a long VALU chain.
    c = jnp.float32(0.7978845608028654)  # sqrt(2/pi)
    return 0.5 * x * (1.0 + jnp.tanh(c * (x + 0.044715 * (x * x * x))))


# --------------------------------------------------------------------------
# Stage 1: multi-head self-attention + residual, partial BN1 statistics.
# --------------------------------------------------------------------------
def _attn_stage_kernel(x_ref, wqkv_ref, bqkv_ref, wo_ref, bo_ref,
                       y_ref, stats_ref, ctx_ref, *, n_heads):
    TB, L, D = x_ref.shape
    dk = D // n_heads
    rows = TB * L
    scale = jnp.float32(1.0 / (dk ** 0.5))

    x2 = x_ref[...].astype(jnp.float32).reshape(rows, D)

    # Fused Q|K|V projection: one full-width bf16 MXU matmul, f32 bias add,
    # single downcast. q/k/v are sliced per head from this one bf16 buffer.
    qkv = (jnp.dot(x2.astype(jnp.bfloat16), wqkv_ref[...],
                   preferred_element_type=jnp.float32) + bqkv_ref[...])
    qkv = qkv.astype(jnp.bfloat16).reshape(TB, L, 3 * D)

    # One dense K transpose per tile -> per-head QK^T needs no rhs transpose.
    k_t = jnp.swapaxes(qkv[:, :, D:2 * D], 1, 2)           # bf16 [TB, D, L]

    for h in range(n_heads):                                # no weights touched
        lo, hi = h * dk, (h + 1) * dk
        qh = qkv[:, :, lo:hi]                               # [TB, L, dk] bf16
        kth = k_t[:, lo:hi, :]                              # [TB, dk, L] bf16
        vh = qkv[:, :, 2 * D + lo:2 * D + hi]               # [TB, L, dk] bf16

        s = jnp.einsum('bld,bdm->blm', qh, kth,
                       preferred_element_type=jnp.float32) * scale
        s = s - jnp.max(s, axis=-1, keepdims=True)
        p = jnp.exp(s)
        p = p * pl.reciprocal(jnp.sum(p, axis=-1, keepdims=True), approx=True)
        ch = jnp.einsum('blm,bmd->bld', p.astype(jnp.bfloat16), vh,
                        preferred_element_type=jnp.float32)
        # Scatter this head's context into its lane offset of the VMEM scratch
        # (replaces the ctx_heads list + lane concatenate).
        ctx_ref[:, lo:hi] = ch.reshape(rows, dk).astype(ctx_ref.dtype)

    # Single full-width output projection from the bf16 context scratch.
    attn = jnp.dot(ctx_ref[...], wo_ref[...],
                   preferred_element_type=jnp.float32) + bo_ref[...]

    y = x2 + attn                                           # dropout_attn: identity
    y_b = y.astype(y_ref.dtype)                             # bf16 stage boundary
    y_ref[...] = y_b

    # Per-tile partial BN1 stats on the *stored* (rounded) value so stage-2
    # normalization is self-consistent with what it reads back.
    y_r = y_b.astype(jnp.float32)
    stats_ref[0:1, :] = jnp.sum(y_r, axis=0, keepdims=True)
    stats_ref[1:2, :] = jnp.sum(y_r * y_r, axis=0, keepdims=True)


# --------------------------------------------------------------------------
# Stage 2: BN1 apply (pre-folded scale/shift) + FFN + residual, BN2 partials.
# --------------------------------------------------------------------------
def _ffn_stage_kernel(y_ref, scale1_ref, shift1_ref,
                      w1_ref, b1_ref, w2_ref, b2_ref,
                      z_ref, stats_ref):
    yn = y_ref[...].astype(jnp.float32) * scale1_ref[...] + shift1_ref[...]

    h = jnp.dot(yn.astype(jnp.bfloat16), w1_ref[...],
                preferred_element_type=jnp.float32) + b1_ref[...]
    h = _gelu(h)
    ff = jnp.dot(h.astype(jnp.bfloat16), w2_ref[...],
                 preferred_element_type=jnp.float32) + b2_ref[...]

    z = yn + ff                                             # dropout_ffn: identity
    z_b = z.astype(z_ref.dtype)                             # bf16 stage boundary
    z_ref[...] = z_b

    z_r = z_b.astype(jnp.float32)
    stats_ref[0:1, :] = jnp.sum(z_r, axis=0, keepdims=True)
    stats_ref[1:2, :] = jnp.sum(z_r * z_r, axis=0, keepdims=True)


# --------------------------------------------------------------------------
# Stage 3: BN2 apply (pre-folded scale/shift).
# --------------------------------------------------------------------------
def _norm_stage_kernel(z_ref, scale2_ref, shift2_ref, out_ref):
    z = z_ref[...].astype(jnp.float32)
    out_ref[...] = (z * scale2_ref[...] + shift2_ref[...]).astype(out_ref.dtype)


# --------------------------------------------------------------------------
# Host-side BN finalize: partial (sum, sumsq) -> fused (scale, shift).
# --------------------------------------------------------------------------
def _bn_fold(stats, n_rows, gamma, beta):
    tot = jnp.sum(stats, axis=0)                            # (2, D)
    inv_n = jnp.float32(1.0 / n_rows)
    mean = tot[0:1, :] * inv_n
    var = tot[1:2, :] * inv_n - mean * mean                 # biased variance
    rstd = lax.rsqrt(var + BN_EPS)
    scale = gamma * rstd
    shift = beta - mean * scale
    return scale.astype(jnp.float32), shift.astype(jnp.float32)


# --------------------------------------------------------------------------
# Tile-size helpers. Row blocks are kept 16-aligned (bf16 sublane packing) or
# full-extent, and we aim for >= 2 grid steps so both v7x TensorCores engage.
# --------------------------------------------------------------------------
def _pick_batch_tile(B, L, target_rows=1024, min_grid=2):
    cap = max(1, B // min_grid) if B >= min_grid else B
    tb = max(1, min(cap, max(1, target_rows // max(L, 1))))
    for t in range(tb, 0, -1):
        if B % t == 0 and (t * L) % 16 == 0:
            return t
    return B                       # single full-extent tile is always legal


def _pick_row_tile(N, target=1024, min_grid=2):
    cap = N // min_grid if N >= 32 else N
    hi = min(max(cap, 16), max(target, 16))
    hi -= hi % 16
    for t in range(hi, 15, -16):
        if N % t == 0:
            return t
    return N                       # single full-extent tile is always legal


# --------------------------------------------------------------------------
# Wrapper.
# --------------------------------------------------------------------------
def tst_encoder_layer(src, params, n_heads, *, batch_tile=None, row_tile=None,
                      vmem_limit_bytes=48 * 1024 * 1024,
                      single_buffer_resident=False):
    B, L, D = src.shape
    assert D % n_heads == 0
    N = B * L
    F = params['w1'].shape[1]

    if batch_tile is None:
        batch_tile = _pick_batch_tile(B, L)
    if row_tile is None:
        row_tile = _pick_row_tile(N)
    assert B % batch_tile == 0 and N % row_tile == 0
    rows1 = batch_tile * L
    assert rows1 % 16 == 0 or rows1 == N
    assert row_tile % 16 == 0 or row_tile == N

    t1 = B // batch_tile
    t2 = N // row_tile

    f32, bf16 = jnp.float32, jnp.bfloat16

    # Host-side weight prep: fuse Q|K|V, cast matmul weights to bf16 (halves
    # resident VMEM + weight DMA); biases / BN params stay f32.
    wqkv = jnp.concatenate([params['wq'], params['wk'], params['wv']], axis=1).astype(bf16)
    bqkv = jnp.concatenate([params['bq'], params['bk'], params['bv']], axis=1).astype(f32)
    wo, bo = params['wo'].astype(bf16), params['bo'].astype(f32)
    w1, b1 = params['w1'].astype(bf16), params['b1'].astype(f32)
    w2, b2 = params['w2'].astype(bf16), params['b2'].astype(f32)
    g1, be1 = params['g1'].astype(f32), params['be1'].astype(f32)
    g2, be2 = params['g2'].astype(f32), params['be2'].astype(f32)

    cp = pltpu.CompilerParams(
        dimension_semantics=("parallel",),          # shard grid over v7x's 2 TCs
        vmem_limit_bytes=vmem_limit_bytes,          # raise toward ~96 MiB on v5e/v6e
    )

    def resident(shape):
        # Whole-array block, constant index_map -> stays VMEM-resident.
        kwargs = {}
        if single_buffer_resident:                  # v7x (64 MiB VMEM): halve
            kwargs['pipeline_mode'] = pl.Buffered(1)  # resident weight buffers
        return pl.BlockSpec(shape, lambda i, _n=len(shape): (0,) * _n, **kwargs)

    # ---------------- stage 1: attention + residual -----------------------
    y, stats1 = pl.pallas_call(
        partial(_attn_stage_kernel, n_heads=n_heads),
        grid=(t1,),
        in_specs=[
            pl.BlockSpec((batch_tile, L, D), lambda i: (i, 0, 0)),   # src tile
            resident((D, 3 * D)), resident((1, 3 * D)),              # wqkv, bqkv
            resident((D, D)), resident((1, D)),                      # wo, bo
        ],
        out_specs=(
            pl.BlockSpec((rows1, D), lambda i: (i, 0)),              # y (bf16)
            pl.BlockSpec((None, 2, D), lambda i: (i, 0, 0)),         # BN1 partials
        ),
        out_shape=(
            jax.ShapeDtypeStruct((N, D), bf16),
            jax.ShapeDtypeStruct((t1, 2, D), f32),
        ),
        scratch_shapes=[pltpu.VMEM((rows1, D), bf16)],               # ctx scratch
        compiler_params=cp,
    )(src, wqkv, bqkv, wo, bo)

    # Finalize BN1 once on host-side XLA (tiny), fold affine into scale/shift.
    scale1, shift1 = _bn_fold(stats1, N, g1, be1)

    # ---------------- stage 2: BN1 + FFN + residual ------------------------
    z, stats2 = pl.pallas_call(
        _ffn_stage_kernel,
        grid=(t2,),
        in_specs=[
            pl.BlockSpec((row_tile, D), lambda i: (i, 0)),           # y tile (bf16)
            resident((1, D)), resident((1, D)),                      # scale1, shift1
            resident((D, F)), resident((1, F)),                      # w1, b1
            resident((F, D)), resident((1, D)),                      # w2, b2
        ],
        out_specs=(
            pl.BlockSpec((row_tile, D), lambda i: (i, 0)),           # z (bf16)
            pl.BlockSpec((None, 2, D), lambda i: (i, 0, 0)),         # BN2 partials
        ),
        out_shape=(
            jax.ShapeDtypeStruct((N, D), bf16),
            jax.ShapeDtypeStruct((t2, 2, D), f32),
        ),
        compiler_params=cp,
    )(y, scale1, shift1, w1, b1, w2, b2)

    scale2, shift2 = _bn_fold(stats2, N, g2, be2)

    # ---------------- stage 3: BN2 -----------------------------------------
    out = pl.pallas_call(
        _norm_stage_kernel,
        grid=(t2,),
        in_specs=[
            pl.BlockSpec((row_tile, D), lambda i: (i, 0)),           # z tile (bf16)
            resident((1, D)), resident((1, D)),                      # scale2, shift2
        ],
        out_specs=pl.BlockSpec((row_tile, D), lambda i: (i, 0)),
        out_shape=jax.ShapeDtypeStruct((N, D), src.dtype),
        compiler_params=cp,
    )(z, scale2, shift2)

    return out.reshape(B, L, D)


# ------------------------- pure-JAX reference (f32) -------------------------
def _reference(src, p, n_heads):
    B, L, D = src.shape
    dk = D // n_heads
    x2 = src.reshape(B * L, D)

    def proj(w, b):
        return (x2 @ w + b).reshape(B, L, n_heads, dk).transpose(0, 2, 1, 3)

    q = proj(p['wq'], p['bq'])
    k = proj(p['wk'], p['bk'])
    v = proj(p['wv'], p['bv'])
    s = jnp.einsum('bhqd,bhkd->bhqk', q, k) / jnp.sqrt(jnp.float32(dk))
    a = jax.nn.softmax(s, axis=-1)
    ctx = jnp.einsum('bhqk,bhkd->bhqd', a, v).transpose(0, 2, 1, 3).reshape(B * L, D)
    attn_out = ctx @ p['wo'] + p['bo']

    def bn(x, g, b):
        m = jnp.mean(x, axis=0, keepdims=True)
        v_ = jnp.mean((x - m) ** 2, axis=0, keepdims=True)
        return (x - m) / jnp.sqrt(v_ + BN_EPS) * g + b

    y = bn(x2 + attn_out, p['g1'], p['be1'])
    h = jax.nn.gelu(y @ p['w1'] + p['b1'], approximate=False)   # PyTorch-exact GELU
    ff = h @ p['w2'] + p['b2']
    z = bn(y + ff, p['g2'], p['be2'])
    return z.reshape(B, L, D)


if __name__ == "__main__":
    # Small demo shapes: bs=4, q_len=8, d_model=32, n_heads=4, d_ff=64.
    B, L, D, H, D_FF = 4, 8, 32, 4, 64

    keys = jax.random.split(jax.random.PRNGKey(0), 17)
    sc = 0.05

    params = {
        'wq': sc * jax.random.normal(keys[0], (D, D), jnp.float32),
        'bq': sc * jax.random.normal(keys[1], (1, D), jnp.float32),
        'wk': sc * jax.random.normal(keys[2], (D, D), jnp.float32),
        'bk': sc * jax.random.normal(keys[3], (1, D), jnp.float32),
        'wv': sc * jax.random.normal(keys[4], (D, D), jnp.float32),
        'bv': sc * jax.random.normal(keys[5], (1, D), jnp.float32),
        'wo': sc * jax.random.normal(keys[6], (D, D), jnp.float32),
        'bo': sc * jax.random.normal(keys[7], (1, D), jnp.float32),
        'w1': sc * jax.random.normal(keys[8], (D, D_FF), jnp.float32),
        'b1': sc * jax.random.normal(keys[9], (1, D_FF), jnp.float32),
        'w2': sc * jax.random.normal(keys[10], (D_FF, D), jnp.float32),
        'b2': sc * jax.random.normal(keys[11], (1, D), jnp.float32),
        # BatchNorm affine params (PyTorch init weight=1, bias=0; perturbed)
        'g1': 1.0 + 0.1 * jax.random.normal(keys[12], (1, D), jnp.float32),
        'be1': 0.1 * jax.random.normal(keys[13], (1, D), jnp.float32),
        'g2': 1.0 + 0.1 * jax.random.normal(keys[14], (1, D), jnp.float32),
        'be2': 0.1 * jax.random.normal(keys[15], (1, D), jnp.float32),
    }

    src = jax.random.normal(keys[16], (B, L, D), jnp.float32)

    layer = jax.jit(partial(tst_encoder_layer, n_heads=H))
    out = jax.block_until_ready(layer(src, params))

    ref = _reference(src, params, H)
    assert out.shape == (B, L, D)
    # bf16 MXU inputs + bf16 stage boundaries + tanh GELU vs. an all-f32,
    # exact-erf reference -> mixed-precision tolerance.
    assert jnp.allclose(out, ref, atol=2e-2, rtol=2e-2), \
        f"max err {float(jnp.max(jnp.abs(out - ref)))}"

    print("KERNEL_OK")
</pallas_src>

<mosaic_0001>
module attributes {stable_mosaic.version = 11 : i64} {
  func.func @_attn_stage_kernel(%arg0: i32, %arg1: memref<2x8x32xf32, #tpu.memory_space<vmem>>, %arg2: memref<32x96xbf16, #tpu.memory_space<vmem>>, %arg3: memref<1x96xf32, #tpu.memory_space<vmem>>, %arg4: memref<32x32xbf16, #tpu.memory_space<vmem>>, %arg5: memref<1x32xf32, #tpu.memory_space<vmem>>, %arg6: memref<16x32xbf16, #tpu.memory_space<vmem>>, %arg7: memref<1x2x32xf32, #tpu.memory_space<vmem>>, %arg8: memref<16x32xbf16, #tpu.memory_space<vmem>>) attributes {dimension_semantics = [#tpu.dimension_semantics<parallel>], iteration_bounds = array<i64: 2>, scalar_prefetch = 0 : i64, scratch_operands = 1 : i64, tpu.core_type = #tpu.core_type<tc>, window_params = [{transform_indices = @transform_0, window_bounds = array<i64: 2, 8, 32>}, {pipeline_mode = #tpu.pipeline_mode<synchronous>, transform_indices = @transform_1, window_bounds = array<i64: 32, 96>}, {pipeline_mode = #tpu.pipeline_mode<synchronous>, transform_indices = @transform_2, window_bounds = array<i64: 1, 96>}, {pipeline_mode = #tpu.pipeline_mode<synchronous>, transform_indices = @transform_3, window_bounds = array<i64: 32, 32>}, {pipeline_mode = #tpu.pipeline_mode<synchronous>, transform_indices = @transform_4, window_bounds = array<i64: 1, 32>}, {transform_indices = @transform_5, window_bounds = array<i64: 16, 32>}, {transform_indices = @transform_6, window_bounds = array<i64: 1, 2, 32>}]} {
    %c0 = arith.constant 0 : index
    %c0_0 = arith.constant 0 : index
    %c0_1 = arith.constant 0 : index
    %0 = vector.load %arg1[%c0, %c0_0, %c0_1] : memref<2x8x32xf32, #tpu.memory_space<vmem>>, vector<2x8x32xf32>
    %1 = vector.shape_cast %0 : vector<2x8x32xf32> to vector<16x32xf32>
    %2 = arith.truncf %1 : vector<16x32xf32> to vector<16x32xbf16>
    %c0_2 = arith.constant 0 : index
    %c0_3 = arith.constant 0 : index
    %3 = vector.load %arg2[%c0_2, %c0_3] : memref<32x96xbf16, #tpu.memory_space<vmem>>, vector<32x96xbf16>
    %cst = arith.constant dense<0.000000e+00> : vector<16x96xf32>
    %4 = tpu.matmul %2, %3, %cst {dimension_numbers = #tpu.dot_dimension_numbers<[1], [0], [0], [1], [0, 0, 1, 1], [], []>} : vector<16x32xbf16>, vector<32x96xbf16>, vector<16x96xf32> -> vector<16x96xf32>
    %c0_4 = arith.constant 0 : index
    %c0_5 = arith.constant 0 : index
    %5 = vector.load %arg3[%c0_4, %c0_5] : memref<1x96xf32, #tpu.memory_space<vmem>>, vector<1x96xf32>
    %6 = vector.broadcast %5 : vector<1x96xf32> to vector<16x96xf32>
    %7 = arith.addf %4, %6 : vector<16x96xf32>
    %8 = arith.truncf %7 : vector<16x96xf32> to vector<16x96xbf16>
    %9 = vector.shape_cast %8 : vector<16x96xbf16> to vector<2x8x96xbf16>
    %10 = vector.extract_strided_slice %9 {offsets = [0, 0, 32], sizes = [2, 8, 32], strides = [1, 1, 1]} : vector<2x8x96xbf16> to vector<2x8x32xbf16>
    %11 = tpu.transpose %10, [0, 2, 1] : vector<2x8x32xbf16> -> vector<2x32x8xbf16>
    %12 = vector.extract_strided_slice %9 {offsets = [0, 0, 0], sizes = [2, 8, 8], strides = [1, 1, 1]} : vector<2x8x96xbf16> to vector<2x8x8xbf16>
    %13 = vector.extract_strided_slice %11 {offsets = [0, 0, 0], sizes = [2, 8, 8], strides = [1, 1, 1]} : vector<2x32x8xbf16> to vector<2x8x8xbf16>
    %14 = vector.extract_strided_slice %9 {offsets = [0, 0, 64], sizes = [2, 8, 8], strides = [1, 1, 1]} : vector<2x8x96xbf16> to vector<2x8x8xbf16>
    "tpu.trace_start"() <{level = 10 : i32, message = "bld,bdm->blm"}> : () -> ()
    %cst_6 = arith.constant dense<0.000000e+00> : vector<2x8x8xf32>
    %15 = tpu.matmul %12, %13, %cst_6 {dimension_numbers = #tpu.dot_dimension_numbers<[2], [1], [1], [2], [0, 0, 0, 1, 1, 2], [0], [0]>} : vector<2x8x8xbf16>, vector<2x8x8xbf16>, vector<2x8x8xf32> -> vector<2x8x8xf32>
    "tpu.trace_stop"() : () -> ()
    %cst_7 = arith.constant 0.353553385 : f32
    %16 = vector.broadcast %cst_7 : f32 to vector<2x8x8xf32>
    %17 = arith.mulf %15, %16 : vector<2x8x8xf32>
    %cst_8 = arith.constant dense<0xFF800000> : vector<2x8xf32>
    %18 = vector.multi_reduction <maximumf>, %17, %cst_8 [2] : vector<2x8x8xf32> to vector<2x8xf32>
    %19 = vector.shape_cast %18 : vector<2x8xf32> to vector<2x8x1xf32>
    %20 = vector.broadcast %19 : vector<2x8x1xf32> to vector<2x8x8xf32>
    %21 = arith.subf %17, %20 : vector<2x8x8xf32>
    %22 = math.exp %21 : vector<2x8x8xf32>
    %cst_9 = arith.constant dense<0.000000e+00> : vector<2x8xf32>
    %23 = vector.multi_reduction <add>, %22, %cst_9 [2] : vector<2x8x8xf32> to vector<2x8xf32>
    %24 = vector.shape_cast %23 : vector<2x8xf32> to vector<2x8x1xf32>
    %25 = tpu.reciprocal %24 {approx = true} : vector<2x8x1xf32> -> vector<2x8x1xf32>
    %26 = vector.broadcast %25 : vector<2x8x1xf32> to vector<2x8x8xf32>
    %27 = arith.mulf %22, %26 : vector<2x8x8xf32>
    %28 = arith.truncf %27 : vector<2x8x8xf32> to vector<2x8x8xbf16>
    "tpu.trace_start"() <{level = 10 : i32, message = "blm,bmd->bld"}> : () -> ()
    %cst_10 = arith.constant dense<0.000000e+00> : vector<2x8x8xf32>
    %29 = tpu.matmul %28, %14, %cst_10 {dimension_numbers = #tpu.dot_dimension_numbers<[2], [1], [1], [2], [0, 0, 0, 1, 1, 2], [0], [0]>} : vector<2x8x8xbf16>, vector<2x8x8xbf16>, vector<2x8x8xf32> -> vector<2x8x8xf32>
    "tpu.trace_stop"() : () -> ()
    %30 = vector.shape_cast %29 : vector<2x8x8xf32> to vector<16x8xf32>
    %31 = arith.truncf %30 : vector<16x8xf32> to vector<16x8xbf16>
    %c0_11 = arith.constant 0 : index
    %c0_12 = arith.constant 0 : index
    %32 = vector.load %arg8[%c0_11, %c0_12] : memref<16x32xbf16, #tpu.memory_space<vmem>>, vector<16x8xbf16>
    tpu.vector_store %arg8[%c0_11, %c0_12], %31 {strides = array<i32>} : memref<16x32xbf16, #tpu.memory_space<vmem>>, vector<16x8xbf16>,
    %33 = vector.extract_strided_slice %9 {offsets = [0, 0, 8], sizes = [2, 8, 8], strides = [1, 1, 1]} : vector<2x8x96xbf16> to vector<2x8x8xbf16>
    %34 = vector.extract_strided_slice %11 {offsets = [0, 8, 0], sizes = [2, 8, 8], strides = [1, 1, 1]} : vector<2x32x8xbf16> to vector<2x8x8xbf16>
    %35 = vector.extract_strided_slice %9 {offsets = [0, 0, 72], sizes = [2, 8, 8], strides = [1, 1, 1]} : vector<2x8x96xbf16> to vector<2x8x8xbf16>
    "tpu.trace_start"() <{level = 10 : i32, message = "bld,bdm->blm"}> : () -> ()
    %cst_13 = arith.constant dense<0.000000e+00> : vector<2x8x8xf32>
    %36 = tpu.matmul %33, %34, %cst_13 {dimension_numbers = #tpu.dot_dimension_numbers<[2], [1], [1], [2], [0, 0, 0, 1, 1, 2], [0], [0]>} : vector<2x8x8xbf16>, vector<2x8x8xbf16>, vector<2x8x8xf32> -> vector<2x8x8xf32>
    "tpu.trace_stop"() : () -> ()
    %cst_14 = arith.constant 0.353553385 : f32
    %37 = vector.broadcast %cst_14 : f32 to vector<2x8x8xf32>
    %38 = arith.mulf %36, %37 : vector<2x8x8xf32>
    %cst_15 = arith.constant dense<0xFF800000> : vector<2x8xf32>
    %39 = vector.multi_reduction <maximumf>, %38, %cst_15 [2] : vector<2x8x8xf32> to vector<2x8xf32>
    %40 = vector.shape_cast %39 : vector<2x8xf32> to vector<2x8x1xf32>
    %41 = vector.broadcast %40 : vector<2x8x1xf32> to vector<2x8x8xf32>
    %42 = arith.subf %38, %41 : vector<2x8x8xf32>
    %43 = math.exp %42 : vector<2x8x8xf32>
    %cst_16 = arith.constant dense<0.000000e+00> : vector<2x8xf32>
    %44 = vector.multi_reduction <add>, %43, %cst_16 [2] : vector<2x8x8xf32> to vector<2x8xf32>
    %45 = vector.shape_cast %44 : vector<2x8xf32> to vector<2x8x1xf32>
    %46 = tpu.reciprocal %45 {approx = true} : vector<2x8x1xf32> -> vector<2x8x1xf32>
    %47 = vector.broadcast %46 : vector<2x8x1xf32> to vector<2x8x8xf32>
    %48 = arith.mulf %43, %47 : vector<2x8x8xf32>
    %49 = arith.truncf %48 : vector<2x8x8xf32> to vector<2x8x8xbf16>
    "tpu.trace_start"() <{level = 10 : i32, message = "blm,bmd->bld"}> : () -> ()
    %cst_17 = arith.constant dense<0.000000e+00> : vector<2x8x8xf32>
    %50 = tpu.matmul %49, %35, %cst_17 {dimension_numbers = #tpu.dot_dimension_numbers<[2], [1], [1], [2], [0, 0, 0, 1, 1, 2], [0], [0]>} : vector<2x8x8xbf16>, vector<2x8x8xbf16>, vector<2x8x8xf32> -> vector<2x8x8xf32>
    "tpu.trace_stop"() : () -> ()
    %51 = vector.shape_cast %50 : vector<2x8x8xf32> to vector<16x8xf32>
    %52 = arith.truncf %51 : vector<16x8xf32> to vector<16x8xbf16>
    %c0_18 = arith.constant 0 : index
    %c8 = arith.constant 8 : index
    %53 = vector.load %arg8[%c0_18, %c8] : memref<16x32xbf16, #tpu.memory_space<vmem>>, vector<16x8xbf16>
    tpu.vector_store %arg8[%c0_18, %c8], %52 {strides = array<i32>} : memref<16x32xbf16, #tpu.memory_space<vmem>>, vector<16x8xbf16>,
    %54 = vector.extract_strided_slice %9 {offsets = [0, 0, 16], sizes = [2, 8, 8], strides = [1, 1, 1]} : vector<2x8x96xbf16> to vector<2x8x8xbf16>
    %55 = vector.extract_strided_slice %11 {offsets = [0, 16, 0], sizes = [2, 8, 8], strides = [1, 1, 1]} : vector<2x32x8xbf16> to vector<2x8x8xbf16>
    %56 = vector.extract_strided_slice %9 {offsets = [0, 0, 80], sizes = [2, 8, 8], strides = [1, 1, 1]} : vector<2x8x96xbf16> to vector<2x8x8xbf16>
    "tpu.trace_start"() <{level = 10 : i32, message = "bld,bdm->blm"}> : () -> ()
    %cst_19 = arith.constant dense<0.000000e+00> : vector<2x8x8xf32>
    %57 = tpu.matmul %54, %55, %cst_19 {dimension_numbers = #tpu.dot_dimension_numbers<[2], [1], [1], [2], [0, 0, 0, 1, 1, 2], [0], [0]>} : vector<2x8x8xbf16>, vector<2x8x8xbf16>, vector<2x8x8xf32> -> vector<2x8x8xf32>
    "tpu.trace_stop"() : () -> ()
    %cst_20 = arith.constant 0.353553385 : f32
    %58 = vector.broadcast %cst_20 : f32 to vector<2x8x8xf32>
    %59 = arith.mulf %57, %58 : vector<2x8x8xf32>
    %cst_21 = arith.constant dense<0xFF800000> : vector<2x8xf32>
    %60 = vector.multi_reduction <maximumf>, %59, %cst_21 [2] : vector<2x8x8xf32> to vector<2x8xf32>
    %61 = vector.shape_cast %60 : vector<2x8xf32> to vector<2x8x1xf32>
    %62 = vector.broadcast %61 : vector<2x8x1xf32> to vector<2x8x8xf32>
    %63 = arith.subf %59, %62 : vector<2x8x8xf32>
    %64 = math.exp %63 : vector<2x8x8xf32>
    %cst_22 = arith.constant dense<0.000000e+00> : vector<2x8xf32>
    %65 = vector.multi_reduction <add>, %64, %cst_22 [2] : vector<2x8x8xf32> to vector<2x8xf32>
    %66 = vector.shape_cast %65 : vector<2x8xf32> to vector<2x8x1xf32>
    %67 = tpu.reciprocal %66 {approx = true} : vector<2x8x1xf32> -> vector<2x8x1xf32>
    %68 = vector.broadcast %67 : vector<2x8x1xf32> to vector<2x8x8xf32>
    %69 = arith.mulf %64, %68 : vector<2x8x8xf32>
    %70 = arith.truncf %69 : vector<2x8x8xf32> to vector<2x8x8xbf16>
    "tpu.trace_start"() <{level = 10 : i32, message = "blm,bmd->bld"}> : () -> ()
    %cst_23 = arith.constant dense<0.000000e+00> : vector<2x8x8xf32>
    %71 = tpu.matmul %70, %56, %cst_23 {dimension_numbers = #tpu.dot_dimension_numbers<[2], [1], [1], [2], [0, 0, 0, 1, 1, 2], [0], [0]>} : vector<2x8x8xbf16>, vector<2x8x8xbf16>, vector<2x8x8xf32> -> vector<2x8x8xf32>
    "tpu.trace_stop"() : () -> ()
    %72 = vector.shape_cast %71 : vector<2x8x8xf32> to vector<16x8xf32>
    %73 = arith.truncf %72 : vector<16x8xf32> to vector<16x8xbf16>
    %c0_24 = arith.constant 0 : index
    %c16 = arith.constant 16 : index
    %74 = vector.load %arg8[%c0_24, %c16] : memref<16x32xbf16, #tpu.memory_space<vmem>>, vector<16x8xbf16>
    tpu.vector_store %arg8[%c0_24, %c16], %73 {strides = array<i32>} : memref<16x32xbf16, #tpu.memory_space<vmem>>, vector<16x8xbf16>,
    %75 = vector.extract_strided_slice %9 {offsets = [0, 0, 24], sizes = [2, 8, 8], strides = [1, 1, 1]} : vector<2x8x96xbf16> to vector<2x8x8xbf16>
    %76 = vector.extract_strided_slice %11 {offsets = [0, 24, 0], sizes = [2, 8, 8], strides = [1, 1, 1]} : vector<2x32x8xbf16> to vector<2x8x8xbf16>
    %77 = vector.extract_strided_slice %9 {offsets = [0, 0, 88], sizes = [2, 8, 8], strides = [1, 1, 1]} : vector<2x8x96xbf16> to vector<2x8x8xbf16>
    "tpu.trace_start"() <{level = 10 : i32, message = "bld,bdm->blm"}> : () -> ()
    %cst_25 = arith.constant dense<0.000000e+00> : vector<2x8x8xf32>
    %78 = tpu.matmul %75, %76, %cst_25 {dimension_numbers = #tpu.dot_dimension_numbers<[2], [1], [1], [2], [0, 0, 0, 1, 1, 2], [0], [0]>} : vector<2x8x8xbf16>, vector<2x8x8xbf16>, vector<2x8x8xf32> -> vector<2x8x8xf32>
    "tpu.trace_stop"() : () -> ()
    %cst_26 = arith.constant 0.353553385 : f32
    %79 = vector.broadcast %cst_26 : f32 to vector<2x8x8xf32>
    %80 = arith.mulf %78, %79 : vector<2x8x8xf32>
    %cst_27 = arith.constant dense<0xFF800000> : vector<2x8xf32>
    %81 = vector.multi_reduction <maximumf>, %80, %cst_27 [2] : vector<2x8x8xf32> to vector<2x8xf32>
    %82 = vector.shape_cast %81 : vector<2x8xf32> to vector<2x8x1xf32>
    %83 = vector.broadcast %82 : vector<2x8x1xf32> to vector<2x8x8xf32>
    %84 = arith.subf %80, %83 : vector<2x8x8xf32>
    %85 = math.exp %84 : vector<2x8x8xf32>
    %cst_28 = arith.constant dense<0.000000e+00> : vector<2x8xf32>
    %86 = vector.multi_reduction <add>, %85, %cst_28 [2] : vector<2x8x8xf32> to vector<2x8xf32>
    %87 = vector.shape_cast %86 : vector<2x8xf32> to vector<2x8x1xf32>
    %88 = tpu.reciprocal %87 {approx = true} : vector<2x8x1xf32> -> vector<2x8x1xf32>
    %89 = vector.broadcast %88 : vector<2x8x1xf32> to vector<2x8x8xf32>
    %90 = arith.mulf %85, %89 : vector<2x8x8xf32>
    %91 = arith.truncf %90 : vector<2x8x8xf32> to vector<2x8x8xbf16>
    "tpu.trace_start"() <{level = 10 : i32, message = "blm,bmd->bld"}> : () -> ()
    %cst_29 = arith.constant dense<0.000000e+00> : vector<2x8x8xf32>
    %92 = tpu.matmul %91, %77, %cst_29 {dimension_numbers = #tpu.dot_dimension_numbers<[2], [1], [1], [2], [0, 0, 0, 1, 1, 2], [0], [0]>} : vector<2x8x8xbf16>, vector<2x8x8xbf16>, vector<2x8x8xf32> -> vector<2x8x8xf32>
    "tpu.trace_stop"() : () -> ()
    %93 = vector.shape_cast %92 : vector<2x8x8xf32> to vector<16x8xf32>
    %94 = arith.truncf %93 : vector<16x8xf32> to vector<16x8xbf16>
    %c0_30 = arith.constant 0 : index
    %c24 = arith.constant 24 : index
    %95 = vector.load %arg8[%c0_30, %c24] : memref<16x32xbf16, #tpu.memory_space<vmem>>, vector<16x8xbf16>
    tpu.vector_store %arg8[%c0_30, %c24], %94 {strides = array<i32>} : memref<16x32xbf16, #tpu.memory_space<vmem>>, vector<16x8xbf16>,
    %c0_31 = arith.constant 0 : index
    %c0_32 = arith.constant 0 : index
    %96 = vector.load %arg8[%c0_31, %c0_32] : memref<16x32xbf16, #tpu.memory_space<vmem>>, vector<16x32xbf16>
    %c0_33 = arith.constant 0 : index
    %c0_34 = arith.constant 0 : index
    %97 = vector.load %arg4[%c0_33, %c0_34] : memref<32x32xbf16, #tpu.memory_space<vmem>>, vector<32x32xbf16>
    %cst_35 = arith.constant dense<0.000000e+00> : vector<16x32xf32>
    %98 = tpu.matmul %96, %97, %cst_35 {dimension_numbers = #tpu.dot_dimension_numbers<[1], [0], [0], [1], [0, 0, 1, 1], [], []>} : vector<16x32xbf16>, vector<32x32xbf16>, vector<16x32xf32> -> vector<16x32xf32>
    %c0_36 = arith.constant 0 : index
    %c0_37 = arith.constant 0 : index
    %99 = vector.load %arg5[%c0_36, %c0_37] : memref<1x32xf32, #tpu.memory_space<vmem>>, vector<1x32xf32>
    %100 = vector.broadcast %99 : vector<1x32xf32> to vector<16x32xf32>
    %101 = arith.addf %98, %100 : vector<16x32xf32>
    %102 = arith.addf %1, %101 : vector<16x32xf32>
    %103 = arith.truncf %102 : vector<16x32xf32> to vector<16x32xbf16>
    %c0_38 = arith.constant 0 : index
    %c0_39 = arith.constant 0 : index
    %104 = vector.load %arg6[%c0_38, %c0_39] : memref<16x32xbf16, #tpu.memory_space<vmem>>, vector<16x32xbf16>
    tpu.vector_store %arg6[%c0_38, %c0_39], %103 {strides = array<i32>} : memref<16x32xbf16, #tpu.memory_space<vmem>>, vector<16x32xbf16>,
    %105 = arith.extf %103 : vector<16x32xbf16> to vector<16x32xf32>
    %cst_40 = arith.constant dense<0.000000e+00> : vector<32xf32>
    %106 = vector.multi_reduction <add>, %105, %cst_40 [0] : vector<16x32xf32> to vector<32xf32>
    %107 = vector.shape_cast %106 : vector<32xf32> to vector<1x32xf32>
    %c0_41 = arith.constant 0 : index
    %c0_42 = arith.constant 0 : index
    %c0_43 = arith.constant 0 : index
    %108 = vector.load %arg7[%c0_41, %c0_42, %c0_43] : memref<1x2x32xf32, #tpu.memory_space<vmem>>, vector<1x1x32xf32>
    %109 = vector.shape_cast %108 : vector<1x1x32xf32> to vector<1x32xf32>
    %110 = vector.shape_cast %107 : vector<1x32xf32> to vector<1x1x32xf32>
    tpu.vector_store %arg7[%c0_41, %c0_42, %c0_43], %110 {strides = array<i32>} : memref<1x2x32xf32, #tpu.memory_space<vmem>>, vector<1x1x32xf32>,
    %111 = arith.mulf %105, %105 : vector<16x32xf32>
    %cst_44 = arith.constant dense<0.000000e+00> : vector<32xf32>
    %112 = vector.multi_reduction <add>, %111, %cst_44 [0] : vector<16x32xf32> to vector<32xf32>
    %113 = vector.shape_cast %112 : vector<32xf32> to vector<1x32xf32>
    %c0_45 = arith.constant 0 : index
    %c1 = arith.constant 1 : index
    %c0_46 = arith.constant 0 : index
    %114 = vector.load %arg7[%c0_45, %c1, %c0_46] : memref<1x2x32xf32, #tpu.memory_space<vmem>>, vector<1x1x32xf32>
    %115 = vector.shape_cast %114 : vector<1x1x32xf32> to vector<1x32xf32>
    %116 = vector.shape_cast %113 : vector<1x32xf32> to vector<1x1x32xf32>
    tpu.vector_store %arg7[%c0_45, %c1, %c0_46], %116 {strides = array<i32>} : memref<1x2x32xf32, #tpu.memory_space<vmem>>, vector<1x1x32xf32>,
    return
  }
  func.func @transform_0(%arg0: i32) -> (i32, i32, i32) {
    %c0_i32 = arith.constant 0 : i32
    %c0_i32_0 = arith.constant 0 : i32
    %c0_i32_1 = arith.constant 0 : i32
    return %arg0, %c0_i32, %c0_i32_0 : i32, i32, i32
  }
  func.func @transform_1(%arg0: i32) -> (i32, i32) {
    %c0_i32 = arith.constant 0 : i32
    %c0_i32_0 = arith.constant 0 : i32
    %c0_i32_1 = arith.constant 0 : i32
    return %c0_i32, %c0_i32_0 : i32, i32
  }
  func.func @transform_2(%arg0: i32) -> (i32, i32) {
    %c0_i32 = arith.constant 0 : i32
    %c0_i32_0 = arith.constant 0 : i32
    %c0_i32_1 = arith.constant 0 : i32
    return %c0_i32, %c0_i32_0 : i32, i32
  }
  func.func @transform_3(%arg0: i32) -> (i32, i32) {
    %c0_i32 = arith.constant 0 : i32
    %c0_i32_0 = arith.constant 0 : i32
    %c0_i32_1 = arith.constant 0 : i32
    return %c0_i32, %c0_i32_0 : i32, i32
  }
  func.func @transform_4(%arg0: i32) -> (i32, i32) {
    %c0_i32 = arith.constant 0 : i32
    %c0_i32_0 = arith.constant 0 : i32
    %c0_i32_1 = arith.constant 0 : i32
    return %c0_i32, %c0_i32_0 : i32, i32
  }
  func.func @transform_5(%arg0: i32) -> (i32, i32) {
    %c0_i32 = arith.constant 0 : i32
    %c0_i32_0 = arith.constant 0 : i32
    return %arg0, %c0_i32 : i32, i32
  }
  func.func @transform_6(%arg0: i32) -> (i32, i32, i32) {
    %c0_i32 = arith.constant 0 : i32
    %c0_i32_0 = arith.constant 0 : i32
    %c0_i32_1 = arith.constant 0 : i32
    return %arg0, %c0_i32, %c0_i32_0 : i32, i32, i32
  }
}

module attributes {stable_mosaic.version = 11 : i64} {
  func.func @_ffn_stage_kernel(%arg0: i32, %arg1: memref<16x32xbf16, #tpu.memory_space<vmem>>, %arg2: memref<1x32xf32, #tpu.memory_space<vmem>>, %arg3: memref<1x32xf32, #tpu.memory_space<vmem>>, %arg4: memref<32x64xbf16, #tpu.memory_space<vmem>>, %arg5: memref<1x64xf32, #tpu.memory_space<vmem>>, %arg6: memref<64x32xbf16, #tpu.memory_space<vmem>>, %arg7: memref<1x32xf32, #tpu.memory_space<vmem>>, %arg8: memref<16x32xbf16, #tpu.memory_space<vmem>>, %arg9: memref<1x2x32xf32, #tpu.memory_space<vmem>>) attributes {dimension_semantics = [#tpu.dimension_semantics<parallel>], iteration_bounds = array<i64: 2>, scalar_prefetch = 0 : i64, scratch_operands = 0 : i64, tpu.core_type = #tpu.core_type<tc>, window_params = [{transform_indices = @transform_0, window_bounds = array<i64: 16, 32>}, {pipeline_mode = #tpu.pipeline_mode<synchronous>, transform_indices = @transform_1, window_bounds = array<i64: 1, 32>}, {pipeline_mode = #tpu.pipeline_mode<synchronous>, transform_indices = @transform_2, window_bounds = array<i64: 1, 32>}, {pipeline_mode = #tpu.pipeline_mode<synchronous>, transform_indices = @transform_3, window_bounds = array<i64: 32, 64>}, {pipeline_mode = #tpu.pipeline_mode<synchronous>, transform_indices = @transform_4, window_bounds = array<i64: 1, 64>}, {pipeline_mode = #tpu.pipeline_mode<synchronous>, transform_indices = @transform_5, window_bounds = array<i64: 64, 32>}, {pipeline_mode = #tpu.pipeline_mode<synchronous>, transform_indices = @transform_6, window_bounds = array<i64: 1, 32>}, {transform_indices = @transform_7, window_bounds = array<i64: 16, 32>}, {transform_indices = @transform_8, window_bounds = array<i64: 1, 2, 32>}]} {
    %c0 = arith.constant 0 : index
    %c0_0 = arith.constant 0 : index
    %0 = vector.load %arg1[%c0, %c0_0] : memref<16x32xbf16, #tpu.memory_space<vmem>>, vector<16x32xbf16>
    %1 = arith.extf %0 : vector<16x32xbf16> to vector<16x32xf32>
    %c0_1 = arith.constant 0 : index
    %c0_2 = arith.constant 0 : index
    %2 = vector.load %arg2[%c0_1, %c0_2] : memref<1x32xf32, #tpu.memory_space<vmem>>, vector<1x32xf32>
    %3 = vector.broadcast %2 : vector<1x32xf32> to vector<16x32xf32>
    %4 = arith.mulf %1, %3 : vector<16x32xf32>
    %c0_3 = arith.constant 0 : index
    %c0_4 = arith.constant 0 : index
    %5 = vector.load %arg3[%c0_3, %c0_4] : memref<1x32xf32, #tpu.memory_space<vmem>>, vector<1x32xf32>
    %6 = vector.broadcast %5 : vector<1x32xf32> to vector<16x32xf32>
    %7 = arith.addf %4, %6 : vector<16x32xf32>
    %8 = arith.truncf %7 : vector<16x32xf32> to vector<16x32xbf16>
    %c0_5 = arith.constant 0 : index
    %c0_6 = arith.constant 0 : index
    %9 = vector.load %arg4[%c0_5, %c0_6] : memref<32x64xbf16, #tpu.memory_space<vmem>>, vector<32x64xbf16>
    %cst = arith.constant dense<0.000000e+00> : vector<16x64xf32>
    %10 = tpu.matmul %8, %9, %cst {dimension_numbers = #tpu.dot_dimension_numbers<[1], [0], [0], [1], [0, 0, 1, 1], [], []>} : vector<16x32xbf16>, vector<32x64xbf16>, vector<16x64xf32> -> vector<16x64xf32>
    %c0_7 = arith.constant 0 : index
    %c0_8 = arith.constant 0 : index
    %11 = vector.load %arg5[%c0_7, %c0_8] : memref<1x64xf32, #tpu.memory_space<vmem>>, vector<1x64xf32>
    %12 = vector.broadcast %11 : vector<1x64xf32> to vector<16x64xf32>
    %13 = arith.addf %10, %12 : vector<16x64xf32>
    %cst_9 = arith.constant 5.000000e-01 : f32
    %14 = vector.broadcast %cst_9 : f32 to vector<16x64xf32>
    %15 = arith.mulf %14, %13 : vector<16x64xf32>
    %16 = arith.mulf %13, %13 : vector<16x64xf32>
    %17 = arith.mulf %16, %13 : vector<16x64xf32>
    %cst_10 = arith.constant 4.471500e-02 : f32
    %18 = vector.broadcast %cst_10 : f32 to vector<16x64xf32>
    %19 = arith.mulf %18, %17 : vector<16x64xf32>
    %20 = arith.addf %13, %19 : vector<16x64xf32>
    %cst_11 = arith.constant 0.797884583 : f32
    %21 = vector.broadcast %cst_11 : f32 to vector<16x64xf32>
    %22 = arith.mulf %21, %20 : vector<16x64xf32>
    %23 = math.tanh %22 : vector<16x64xf32>
    %cst_12 = arith.constant 1.000000e+00 : f32
    %24 = vector.broadcast %cst_12 : f32 to vector<16x64xf32>
    %25 = arith.addf %24, %23 : vector<16x64xf32>
    %26 = arith.mulf %15, %25 : vector<16x64xf32>
    %27 = arith.truncf %26 : vector<16x64xf32> to vector<16x64xbf16>
    %c0_13 = arith.constant 0 : index
    %c0_14 = arith.constant 0 : index
    %28 = vector.load %arg6[%c0_13, %c0_14] : memref<64x32xbf16, #tpu.memory_space<vmem>>, vector<64x32xbf16>
    %cst_15 = arith.constant dense<0.000000e+00> : vector<16x32xf32>
    %29 = tpu.matmul %27, %28, %cst_15 {dimension_numbers = #tpu.dot_dimension_numbers<[1], [0], [0], [1], [0, 0, 1, 1], [], []>} : vector<16x64xbf16>, vector<64x32xbf16>, vector<16x32xf32> -> vector<16x32xf32>
    %c0_16 = arith.constant 0 : index
    %c0_17 = arith.constant 0 : index
    %30 = vector.load %arg7[%c0_16, %c0_17] : memref<1x32xf32, #tpu.memory_space<vmem>>, vector<1x32xf32>
    %31 = vector.broadcast %30 : vector<1x32xf32> to vector<16x32xf32>
    %32 = arith.addf %29, %31 : vector<16x32xf32>
    %33 = arith.addf %7, %32 : vector<16x32xf32>
    %34 = arith.truncf %33 : vector<16x32xf32> to vector<16x32xbf16>
    %c0_18 = arith.constant 0 : index
    %c0_19 = arith.constant 0 : index
    %35 = vector.load %arg8[%c0_18, %c0_19] : memref<16x32xbf16, #tpu.memory_space<vmem>>, vector<16x32xbf16>
    tpu.vector_store %arg8[%c0_18, %c0_19], %34 {strides = array<i32>} : memref<16x32xbf16, #tpu.memory_space<vmem>>, vector<16x32xbf16>,
    %36 = arith.extf %34 : vector<16x32xbf16> to vector<16x32xf32>
    %cst_20 = arith.constant dense<0.000000e+00> : vector<32xf32>
    %37 = vector.multi_reduction <add>, %36, %cst_20 [0] : vector<16x32xf32> to vector<32xf32>
    %38 = vector.shape_cast %37 : vector<32xf32> to vector<1x32xf32>
    %c0_21 = arith.constant 0 : index
    %c0_22 = arith.constant 0 : index
    %c0_23 = arith.constant 0 : index
    %39 = vector.load %arg9[%c0_21, %c0_22, %c0_23] : memref<1x2x32xf32, #tpu.memory_space<vmem>>, vector<1x1x32xf32>
    %40 = vector.shape_cast %39 : vector<1x1x32xf32> to vector<1x32xf32>
    %41 = vector.shape_cast %38 : vector<1x32xf32> to vector<1x1x32xf32>
    tpu.vector_store %arg9[%c0_21, %c0_22, %c0_23], %41 {strides = array<i32>} : memref<1x2x32xf32, #tpu.memory_space<vmem>>, vector<1x1x32xf32>,
    %42 = arith.mulf %36, %36 : vector<16x32xf32>
    %cst_24 = arith.constant dense<0.000000e+00> : vector<32xf32>
    %43 = vector.multi_reduction <add>, %42, %cst_24 [0] : vector<16x32xf32> to vector<32xf32>
    %44 = vector.shape_cast %43 : vector<32xf32> to vector<1x32xf32>
    %c0_25 = arith.constant 0 : index
    %c1 = arith.constant 1 : index
    %c0_26 = arith.constant 0 : index
    %45 = vector.load %arg9[%c0_25, %c1, %c0_26] : memref<1x2x32xf32, #tpu.memory_space<vmem>>, vector<1x1x32xf32>
    %46 = vector.shape_cast %45 : vector<1x1x32xf32> to vector<1x32xf32>
    %47 = vector.shape_cast %44 : vector<1x32xf32> to vector<1x1x32xf32>
    tpu.vector_store %arg9[%c0_25, %c1, %c0_26], %47 {strides = array<i32>} : memref<1x2x32xf32, #tpu.memory_space<vmem>>, vector<1x1x32xf32>,
    return
  }
  func.func @transform_0(%arg0: i32) -> (i32, i32) {
    %c0_i32 = arith.constant 0 : i32
    %c0_i32_0 = arith.constant 0 : i32
    return %arg0, %c0_i32 : i32, i32
  }
  func.func @transform_1(%arg0: i32) -> (i32, i32) {
    %c0_i32 = arith.constant 0 : i32
    %c0_i32_0 = arith.constant 0 : i32
    %c0_i32_1 = arith.constant 0 : i32
    return %c0_i32, %c0_i32_0 : i32, i32
  }
  func.func @transform_2(%arg0: i32) -> (i32, i32) {
    %c0_i32 = arith.constant 0 : i32
    %c0_i32_0 = arith.constant 0 : i32
    %c0_i32_1 = arith.constant 0 : i32
    return %c0_i32, %c0_i32_0 : i32, i32
  }
  func.func @transform_3(%arg0: i32) -> (i32, i32) {
    %c0_i32 = arith.constant 0 : i32
    %c0_i32_0 = arith.constant 0 : i32
    %c0_i32_1 = arith.constant 0 : i32
    return %c0_i32, %c0_i32_0 : i32, i32
  }
  func.func @transform_4(%arg0: i32) -> (i32, i32) {
    %c0_i32 = arith.constant 0 : i32
    %c0_i32_0 = arith.constant 0 : i32
    %c0_i32_1 = arith.constant 0 : i32
    return %c0_i32, %c0_i32_0 : i32, i32
  }
  func.func @transform_5(%arg0: i32) -> (i32, i32) {
    %c0_i32 = arith.constant 0 : i32
    %c0_i32_0 = arith.constant 0 : i32
    %c0_i32_1 = arith.constant 0 : i32
    return %c0_i32, %c0_i32_0 : i32, i32
  }
  func.func @transform_6(%arg0: i32) -> (i32, i32) {
    %c0_i32 = arith.constant 0 : i32
    %c0_i32_0 = arith.constant 0 : i32
    %c0_i32_1 = arith.constant 0 : i32
    return %c0_i32, %c0_i32_0 : i32, i32
  }
  func.func @transform_7(%arg0: i32) -> (i32, i32) {
    %c0_i32 = arith.constant 0 : i32
    %c0_i32_0 = arith.constant 0 : i32
    return %arg0, %c0_i32 : i32, i32
  }
  func.func @transform_8(%arg0: i32) -> (i32, i32, i32) {
    %c0_i32 = arith.constant 0 : i32
    %c0_i32_0 = arith.constant 0 : i32
    %c0_i32_1 = arith.constant 0 : i32
    return %arg0, %c0_i32, %c0_i32_0 : i32, i32, i32
  }
}

module attributes {stable_mosaic.version = 11 : i64} {
  func.func @_norm_stage_kernel(%arg0: i32, %arg1: memref<16x32xbf16, #tpu.memory_space<vmem>>, %arg2: memref<1x32xf32, #tpu.memory_space<vmem>>, %arg3: memref<1x32xf32, #tpu.memory_space<vmem>>, %arg4: memref<16x32xf32, #tpu.memory_space<vmem>>) attributes {dimension_semantics = [#tpu.dimension_semantics<parallel>], iteration_bounds = array<i64: 2>, scalar_prefetch = 0 : i64, scratch_operands = 0 : i64, tpu.core_type = #tpu.core_type<tc>, window_params = [{transform_indices = @transform_0, window_bounds = array<i64: 16, 32>}, {pipeline_mode = #tpu.pipeline_mode<synchronous>, transform_indices = @transform_1, window_bounds = array<i64: 1, 32>}, {pipeline_mode = #tpu.pipeline_mode<synchronous>, transform_indices = @transform_2, window_bounds = array<i64: 1, 32>}, {transform_indices = @transform_3, window_bounds = array<i64: 16, 32>}]} {
    %c0 = arith.constant 0 : index
    %c0_0 = arith.constant 0 : index
    %0 = vector.load %arg1[%c0, %c0_0] : memref<16x32xbf16, #tpu.memory_space<vmem>>, vector<16x32xbf16>
    %1 = arith.extf %0 : vector<16x32xbf16> to vector<16x32xf32>
    %c0_1 = arith.constant 0 : index
    %c0_2 = arith.constant 0 : index
    %2 = vector.load %arg2[%c0_1, %c0_2] : memref<1x32xf32, #tpu.memory_space<vmem>>, vector<1x32xf32>
    %3 = vector.broadcast %2 : vector<1x32xf32> to vector<16x32xf32>
    %4 = arith.mulf %1, %3 : vector<16x32xf32>
    %c0_3 = arith.constant 0 : index
    %c0_4 = arith.constant 0 : index
    %5 = vector.load %arg3[%c0_3, %c0_4] : memref<1x32xf32, #tpu.memory_space<vmem>>, vector<1x32xf32>
    %6 = vector.broadcast %5 : vector<1x32xf32> to vector<16x32xf32>
    %7 = arith.addf %4, %6 : vector<16x32xf32>
    %c0_5 = arith.constant 0 : index
    %c0_6 = arith.constant 0 : index
    %8 = vector.load %arg4[%c0_5, %c0_6] : memref<16x32xf32, #tpu.memory_space<vmem>>, vector<16x32xf32>
    tpu.vector_store %arg4[%c0_5, %c0_6], %7 {strides = array<i32>} : memref<16x32xf32, #tpu.memory_space<vmem>>, vector<16x32xf32>,
    return
  }
  func.func @transform_0(%arg0: i32) -> (i32, i32) {
    %c0_i32 = arith.constant 0 : i32
    %c0_i32_0 = arith.constant 0 : i32
    return %arg0, %c0_i32 : i32, i32
  }
  func.func @transform_1(%arg0: i32) -> (i32, i32) {
    %c0_i32 = arith.constant 0 : i32
    %c0_i32_0 = arith.constant 0 : i32
    %c0_i32_1 = arith.constant 0 : i32
    return %c0_i32, %c0_i32_0 : i32, i32
  }
  func.func @transform_2(%arg0: i32) -> (i32, i32) {
    %c0_i32 = arith.constant 0 : i32
    %c0_i32_0 = arith.constant 0 : i32
    %c0_i32_1 = arith.constant 0 : i32
    return %c0_i32, %c0_i32_0 : i32, i32
  }
  func.func @transform_3(%arg0: i32) -> (i32, i32) {
    %c0_i32 = arith.constant 0 : i32
    %c0_i32_0 = arith.constant 0 : i32
    return %arg0, %c0_i32 : i32, i32
  }
}

</mosaic_0001>

<bundles_post_ra>
// kernel: tst_encoder_layer.5
= control target key start
LH: loop header
LB: loop body
LE: loop exit
PB: predicated region body
PF: predicated region fallthrough
CT: control target
= control target key end

     0   :  { %8 = vsyncpa [#allocation3], 0  ;;  %s500_s0 = inlined_call_operand.vmem [shape: bf16[32,32], index: 0, kind: input, shape index: {}]   ;;  %s501_s1 = inlined_call_operand.vmem [shape: f32[1,32], index: 1, kind: input, shape index: {}]   ;;  %s502_s2 = inlined_call_operand.vmem [shape: f32[1,32], index: 2, kind: input, shape index: {}]   ;;  %s503_s3 = inlined_call_operand.hbm [shape: f32[32,32], index: 3, kind: output, shape index: {}]  }
   0x1   :  { %10 = vsyncpa [#allocation3 + $0x1], 0  ;;  %s415_s12 = smov 0   ;;  %s417_s13 = smov 0  }
   0x2   :  { %s419_s14 = smov 0   ;;  %s421_s15 = smov 0  }
   0x3 LB: > { %s268_s16 = sadd.s32 4294967295, %s391_s15   ;;  %s269_s17 = sadd.s32 4294967294, %s391_s15   ;;  %s391_s15 = sphi %s421_s15, %s509_s15   ;;  %s387_s14 = sphi %s419_s14, %s508_s14   ;;  %s383_s13 = sphi %s417_s13, %s507_s13   ;;  %s379_s12 = sphi %s415_s12, %s506_s12  }
   0x4   : > { %s438_s18 = sadd.s32 1, %s391_s15   ;;  %s91_s19 = sadd.s32 1, %s387_s14 }
   0x5   : > { %s88_s20 = ssub.s32 %s391_s15, %s438_s18  ;;  %p101_p0 = scmp.ne.s32.totalorder %s387_s14, %s383_s13 }
   0x6   : > { %p89_p1 = scmp.eq.s32.totalorder %s88_s20, 0  ;;  %p102_p2 = scmp.eq.s32.totalorder %s268_s16, 1 }
   0x7   : > { %p107_p3 = scmp.ne.s32.totalorder %s383_s13, %s379_s12  ;;  %p108_p4 = scmp.eq.s32.totalorder %s269_s17, 1 }
   0x8   : > { %s448_s21 = scalar_select %p89_p1, %s387_s14, %s91_s19  }
   0x9   : > { %p450_p5 = por %p102_p2, %p101_p0  ;;  %p454_p6 = por %p108_p4, %p107_p3 }
   0xa   : > { %p272_p7 = scmp.ge.s32.totalorder %s391_s15, 1  ;;  %p141_p8 = scmp.lt.s32.totalorder %s391_s15, 3 }
   0xc   : > { %p142_p9 = pnand %p272_p7, %p141_p8 }
   0xd   : > { %s162_s24 = sand.u32 (!%p142_p9), 1, %s383_s13   ;;  %s274_s25 = sshll.u32 (!%p142_p9), %s268_s16, 1 }
   0xe   : > { %145 = sbr.rel (%p142_p9) target bundleno = 34 (0x22), region = 32  ;;  %p166_p10 = scmp.lt.s32.totalorder (!%p142_p9), %s274_s25, 3 }
   0xf   : > { %s273_s26 = sshll.u32 (!%p142_p9), %s162_s24, 4  ;;  %s281_s27 = sshll.u32 (!%p142_p9), %s268_s16, 4 }
  0x10   : > { %s203_s9 = scalar_lea.hbm (!%p142_p9), %s503_s3, %s281_s27  ;;  %s164_s16 = scalar_lea.vmem (!%p142_p9), [#allocation2], %s273_s26 }
  0x11   : > { %s204_s17 = sshll.u32 (!%p142_p9), %s164_s16, 4  ;;  %s206_s19 = sshll.u32 (!%p142_p9), %s203_s9, 4  ;;  %s205_s17 = int_to_ptr.vmem [resolvable:$true] %s204_s17  ;;  %s207_s19 = int_to_ptr.hbm [resolvable:$true] %s206_s19 }
  0x12   : > { %s192_s20 = scalar_lea.sflag (!%p142_p9), [#allocation3], %s162_s24  ;;  %s349_s29 = scalar_lea.hbm (!%p142_p9), %s503_s3, 32 }
  0x13   : > { %s511_s25 = smov (!%p166_p10, %s274_s25), 3  ;;  %v327_v0 = vld [vmem:[%s501_s1] ss:$0 sm:$0xff]  ;;  %vm188_vm0 = vcmask 261120  }
  0x14   : > { %s275_s28 = sshll.u32 %s511_s25, 2  ;;  %v328_v3 = vld [vmem:[%s502_s2] ss:$0 sm:$0xff]  ;;  %s343_s25 = sshra.s32 %s207_s19, 4  ;;  %s344_s25 = int_to_ptr.hbm [resolvable:$true] %s343_s25 }
  0x15   : > { %s169_s4 = scalar_lea.vmem %s500_s0, %s275_s28  ;;  %s345_s27 = scalar_lea.hbm %s344_s25, 16 }
  0x16   : > { %v283_v1 = vld [vmem:[%s169_s4] sm:$0xff]   ;;  %p346_p11 = scmp.ne.s32.totalorder %s344_s25, %s345_s27  ;;  %p350_p0 = scmp.lt.s32.totalorder %s344_s25, %s503_s3 }
  0x17   : > { %v284_v2 = vunpack.c.l.bf16 %v283_v1  ;;  %v285_v4 = vunpack.c.h.bf16 %v283_v1  ;;  %p351_p1 = scmp.lt.s32.totalorder %s349_s29, %s345_s27 }
  0x18   : > { %p347_p12 = pnand %p346_p11, %p450_p5 }
  0x19   : > { %v180_v5 = vmul.f32 %v327_v0, %v284_v2  ;;  %v181_v6 = vmul.f32 %v327_v0, %v285_v4  ;;  %p352_p2 = por %p351_p1, %p350_p0 }
  0x1a   : > { %p348_p13 = pneg %p347_p12 }
  0x1b   : > { %v186_v7 = vadd.f32 %v328_v3, %v180_v5  ;;  %v187_v8 = vadd.f32 %v328_v3, %v181_v6 }
  0x1c   : > { %p353_p3 = pnand %p352_p2, %p348_p13 }
  0x1d   : > { %189 = vst.msk [vmem:[%s164_s16] sm:$0xff] %vm188_vm0, %v186_v7 }
  0x1e   : > { %190 = vst.msk [vmem:[%s164_s16 + $0x8] sm:$0xff] %vm188_vm0, %v187_v8 }
  0x1f   : > { %356 = shalt.err (!%p353_p3)
}
  0x20   : > { %s393_s24 = smov 128   ;;  %s394_s5 = smov 8  }
  0x21   : > { %286 = dma.vmem_to_hbm [thread:$0]  (%p450_p5), %s205_s17, 256, %s207_s19, %s192_s20, %s393_s24, %s393_s24, %s394_s5  }
  0x22 PF: > { %p292_p4 = scmp.ge.s32.totalorder %s391_s15, 2  ;;  %s221_s6 = sand.u32 1, %s379_s12  }
  0x23   : > { %s222_s7 = scalar_lea.sflag [#allocation3], %s221_s6 }
  0x24   : > { %p289_p7 = pnand %p292_p4, %p454_p6 }
  0x26   : > { %p290_p8 = pneg %p289_p7 }
  0x28   : > { %374 = dma.done.wait (%p290_p8), %s222_s7, 256  }
  0x29   : > { %376 = vsyncadd (%p290_p8), %s222_s7, 4294967040  ;;  %p13_p9 = scmp.ge.s32.totalorder %s438_s18, 4   ;;  %s506_s12 = smov %s383_s13 }
  0x2a   : > { %s507_s13 = smov %s387_s14  ;;  %s508_s14 = smov %s448_s21 }
  0x2b   : > { %s509_s15 = smov %s438_s18  ;;  %15 = sbr.rel (!%p13_p9) target bundleno = 3 (0x3), region = 67 }
  0x30   :  { %228 = vsyncpa [#allocation3], 1 }
  0x31   :  { %230 = vsyncpa [#allocation3 + $0x1], 1 }

// kernel: tst_encoder_layer.4
= control target key start
LH: loop header
LB: loop body
LE: loop exit
PB: predicated region body
PF: predicated region fallthrough
CT: control target
= control target key end

     0   :  { %s685_s27 = smov 0   ;;  %s752_s0 = inlined_call_operand.vmem [shape: bf16[32,32], index: 0, kind: input, shape index: {}]   ;;  %s753_s1 = inlined_call_operand.vmem [shape: f32[1,32], index: 1, kind: input, shape index: {}]   ;;  %s754_s2 = inlined_call_operand.vmem [shape: f32[1,32], index: 2, kind: input, shape index: {}]   ;;  %s755_s3 = inlined_call_operand.vmem [shape: bf16[32,64], index: 3, kind: input, shape index: {}]   ;;  %s756_s4 = inlined_call_operand.vmem [shape: f32[1,64], index: 4, kind: input, shape index: {}]   ;;  %s757_s5 = inlined_call_operand.vmem [shape: bf16[64,32], index: 5, kind: input, shape index: {}]   ;;  %s758_s6 = inlined_call_operand.vmem [shape: f32[1,32], index: 6, kind: input, shape index: {}]   ;;  %s759_s7 = inlined_call_operand.vmem [shape: bf16[32,32], index: 7, kind: output, shape index: {0}]   ;;  %s760_s8 = inlined_call_operand.vmem [shape: f32[2,2,32], index: 8, kind: output, shape index: {1}]  }
   0x1 LB: > { %s691_s28 = sadd.s32 4294967295, %s638_s27   ;;  %p572_p0 = scmp.ge.s32.totalorder %s638_s27, 1  ;;  %s638_s27 = sphi %s685_s27, %s19_s27  }
   0x2   : > { %p266_p1 = scmp.lt.s32.totalorder %s638_s27, 3 }
   0x4   : > { %p267_p2 = pnand %p572_p0, %p266_p1 }
   0x5   : > { %s573_s9 = sshll.u32 (!%p267_p2), %s691_s28, 1  ;;  %p316_p4 = scmp.lt.s32.totalorder (!%p267_p2), %s691_s28, 1 }
   0x6   : > { %270 = sbr.rel (%p267_p2) target bundleno = 342 (0x156), region = 48  ;;  %p305_p3 = scmp.lt.s32.totalorder (!%p267_p2), %s573_s9, 3 }
   0xb   : > { %v607_v0 = vld [vmem:[%s755_s3 + $0x8] sm:$0xff]  ;;  %v606_v1 = vld [vmem:[%s755_s3] sm:$0xff]  ;;  %s762_s9 = smov (!%p305_p3, %s573_s9), 3  ;;  %vm358_vm0 = vcmask 261120   ;;  %v611_v12 = vld [vmem:[%s757_s5 + $0x18] sm:$0xff]  ;;  %vm431_vm1 = vcmask 523264  }
   0xc   : > { %368 = vmatpush.bf16.msra.mxu0 %v607_v0  ;;  %s574_s12 = sshll.u32 %s762_s9, 2  ;;  %v624_v2 = vld [vmem:[%s753_s1] ss:$0 sm:$0xff]  ;;  %439 = vmatpush.bf16.msra.mxu1 %v611_v12  ;;  %v610_v13 = vld [vmem:[%s757_s5 + $0x10] sm:$0xff]  ;;  %v609_v14 = vld [vmem:[%s757_s5 + $0x8] sm:$0xff]  ;;  %vm453_vm2 = vcmask 257024  }
   0xd   : > { %s308_s15 = scalar_lea.vmem %s752_s0, %s574_s12  ;;  %v625_v6 = vld [vmem:[%s754_s2] ss:$0 sm:$0xff]  ;;  %s314_s16 = scalar_lea.vmem %s759_s7, %s574_s12  ;;  %vm467_vm3 = vcmask 253952  }
   0xe   : > { %v613_v3 = vld [vmem:[%s308_s15] sm:$0xff]   ;;  %s764_s28 = smov (!%p316_p4, %s691_s28), 1 }
   0xf   : > { %v614_v4 = vunpack.c.l.bf16 %v613_v3  ;;  %v615_v5 = vunpack.c.h.bf16 %v613_v3  ;;  %v608_v15 = vld [vmem:[%s757_s5] sm:$0xff]  ;;  %s577_s9 = sshll.u32 %s764_s28, 1 }
  0x10   : > { %369 = vmatpush.bf16.msra.mxu0 %v606_v1  ;;  %440 = vmatpush.bf16.msra.mxu1 %v610_v13  ;;  %v626_v16 = vld [vmem:[%s756_s4] ss:$0 sm:$0xff]  ;;  %s319_s18 = scalar_lea.vmem %s760_s8, %s577_s9 }
  0x11   : > { %v329_v7 = vmul.f32 %v624_v2, %v614_v4  ;;  %v330_v8 = vmul.f32 %v624_v2, %v615_v5  ;;  %v627_v40 = vld [vmem:[%s758_s6] ss:$0 sm:$0xff] }
  0x13   : > { %v335_v9 = vadd.f32 %v625_v6, %v329_v7  ;;  %v336_v10 = vadd.f32 %v625_v6, %v330_v8 }
  0x14   : > { %441 = vmatpush.bf16.msra.mxu1 %v609_v14 }
  0x15   : > { %v337_v11 = vpack.c.bf16 %v336_v10, %v335_v9 }
  0x17   : > { %586 = vmatmul.msk.bf16.vlgmr.msra.gmra.mxu0 %vm358_vm0, %v337_v11 }
  0x18   : > { %442 = vmatpush.bf16.msra.mxu1 %v608_v15 }
  0x94   : > { %v371_v17 = vpop.f32.mrf.mxu0 }
  0x95   : > { %v372_v18 = vadd.f32 %v626_v16, %v371_v17 }
  0x97   : > { %v378_v19 = vmul.f32 %v372_v18, %v372_v18  ;;  %v376_v34 = vmul.f32 0.5, %v372_v18 }
  0x99   : > { %v380_v20 = vmul.f32 %v378_v19, %v372_v18 }
  0x9b   : > { %v382_v21 = vmul.f32 0.044715, %v380_v20 }
  0x9c   : > { %v373_v22 = vpop.f32.mrf.mxu0 }
  0x9d   : > { %v384_v23 = vadd.f32 %v382_v21, %v372_v18  ;;  %v374_v24 = vadd.f32 %v626_v16, %v373_v22 }
  0x9f   : > { %v379_v25 = vmul.f32 %v374_v24, %v374_v24  ;;  %v386_v26 = vmul.f32 0.7978846, %v384_v23  ;;  %v377_v35 = vmul.f32 0.5, %v374_v24 }
  0xa1   : > { %v381_v27 = vmul.f32 %v379_v25, %v374_v24  ;;  %628 = vtanh.f32 %v386_v26 }
  0xa3   : > { %v383_v28 = vmul.f32 0.044715, %v381_v27 }
  0xa5   : > { %v385_v29 = vadd.f32 %v383_v28, %v374_v24 }
  0xa7   : > { %v387_v30 = vmul.f32 0.7978846, %v385_v29  ;;  %v629_v31 = vpop.eup %628 }
  0xa8   : > { %v390_v32 = vadd.f32 1.0, %v629_v31 }
  0xa9   : > { %630 = vtanh.f32 %v387_v30 }
  0xaa   : > { %v392_v37 = vmul.f32 %v390_v32, %v376_v34 }
  0xaf   : > { %v631_v33 = vpop.eup %630 }
  0xb0   : > { %v391_v36 = vadd.f32 1.0, %v631_v33 }
  0xb2   : > { %v393_v38 = vmul.f32 %v391_v36, %v377_v35 }
  0xb4   : > { %v394_v39 = vpack.c.bf16 %v393_v38, %v392_v37 }
  0xb6   : > { %603 = vmatmul.msk.bf16.vlgmr.msra.gmra.mxu1 %vm431_vm1, %v394_v39 }
 0x133   : > { %v444_v41 = vpop.f32.mrf.mxu1 }
 0x134   : > { %v445_v42 = vadd.f32 %v627_v40, %v444_v41 }
 0x136   : > { %v449_v43 = vadd.f32 %v445_v42, %v335_v9 }
 0x138   : > { %v451_v44 = vpack.c.bf16 %v449_v43, %v449_v43 }
 0x13a   : > { %454 = vst.msk [vmem:[%s314_s16] sm:$0xf] %vm453_vm2, %v451_v44  ;;  %v456_v47 = vunpack.c.l.bf16 %v451_v44 }
 0x13b   : > { %v446_v45 = vpop.f32.mrf.mxu1 }
 0x13c   : > { %v447_v46 = vadd.f32 %v627_v40, %v446_v45  ;;  %v469_v50 = vmul.f32 %v456_v47, %v456_v47  ;;  %v458_v52 = vsel %vm358_vm0, %v456_v47, 0.0 }
 0x13e   : > { %v450_v48 = vadd.f32 %v447_v46, %v336_v10  ;;  %v471_v56 = vsel %vm358_vm0, %v469_v50, 0.0 }
 0x140   : > { %v452_v49 = vpack.c.bf16 %v450_v48, %v450_v48 }
 0x142   : > { %455 = vst.msk [vmem:[%s314_s16 + $0x4] sm:$0xf] %vm453_vm2, %v452_v49  ;;  %v457_v51 = vunpack.c.l.bf16 %v452_v49 }
 0x144   : > { %v459_v53 = vsel %vm358_vm0, %v457_v51, 0.0  ;;  %v470_v54 = vmul.f32 %v457_v51, %v457_v51 }
 0x145   : > { %v460_v55 = vadd.f32 %v459_v53, %v458_v52 }
 0x146   : > { %v472_v57 = vsel %vm358_vm0, %v470_v54, 0.0 }
 0x147   : > { %v461_v58 = vrot.slane %v460_v55, 4  ;;  %v473_v59 = vadd.f32 %v472_v57, %v471_v56 }
 0x149   : > { %v462_v60 = vadd.f32 %v461_v58, %v460_v55  ;;  %v474_v61 = vrot.slane %v473_v59, 4 }
 0x14b   : > { %v463_v62 = vrot.slane %v462_v60, 2  ;;  %v475_v63 = vadd.f32 %v474_v61, %v473_v59 }
 0x14d   : > { %v464_v0 = vadd.f32 %v463_v62, %v462_v60  ;;  %v476_v1 = vrot.slane %v475_v63, 2 }
 0x14f   : > { %v465_v2 = vrot.slane %v464_v0, 1  ;;  %v477_v3 = vadd.f32 %v476_v1, %v475_v63 }
 0x151   : > { %v466_v4 = vadd.f32 %v465_v2, %v464_v0  ;;  %v478_v5 = vrot.slane %v477_v3, 1 }
 0x153   : > { %468 = vst.msk [vmem:[%s319_s18] sm:$0x1] %vm467_vm3, %v466_v4  ;;  %v479_v6 = vadd.f32 %v478_v5, %v477_v3 }
 0x155   : > { %480 = vst.msk [vmem:[%s319_s18 + $0x1] sm:$0x1] %vm467_vm3, %v479_v6 }
 0x156 PF: > { %s19_s27 = sadd.s32 1, %s638_s27  }
 0x157   : > { %p16_p5 = scmp.ge.s32.totalorder %s19_s27, 4  }
 0x159   :  { %18 = sbr.rel (!%p16_p5) target bundleno = 1 (0x1), region = 90 }

// kernel: tst_encoder_layer.3
= control target key start
LH: loop header
LB: loop body
LE: loop exit
PB: predicated region body
PF: predicated region fallthrough
CT: control target
= control target key end

     0   :  { %s1145_s21 = smov 0   ;;  %s1300_s0 = inlined_call_operand.vmem [shape: f32[4,8,32], index: 0, kind: input, shape index: {}]   ;;  %s1301_s1 = inlined_call_operand.vmem [shape: bf16[32,96], index: 1, kind: input, shape index: {}]   ;;  %s1302_s2 = inlined_call_operand.vmem [shape: f32[1,96], index: 2, kind: input, shape index: {}]   ;;  %s1303_s3 = inlined_call_operand.vmem [shape: bf16[32,32], index: 3, kind: input, shape index: {}]   ;;  %s1304_s4 = inlined_call_operand.vmem [shape: f32[1,32], index: 4, kind: input, shape index: {}]   ;;  %s1305_s5 = inlined_call_operand.vmem [shape: bf16[32,32], index: 5, kind: output, shape index: {0}]   ;;  %s1306_s6 = inlined_call_operand.vmem [shape: f32[2,2,32], index: 6, kind: output, shape index: {1}]  }
   0x1 LB: > { %s1151_s22 = sadd.s32 4294967295, %s1094_s21   ;;  %p981_p0 = scmp.ge.s32.totalorder %s1094_s21, 1  ;;  %s1094_s21 = sphi %s1145_s21, %s17_s21  }
   0x2   : > { %p216_p1 = scmp.lt.s32.totalorder %s1094_s21, 3 }
   0x4   : > { %p217_p2 = pnand %p981_p0, %p216_p1 }
   0x5   : > { %s982_s25 = sshll.u32 (!%p217_p2), %s1151_s22, 1  ;;  %s1096_s10 = smov (!%p217_p2), 120  }
   0x6   : > { %220 = sbr.rel (%p217_p2) target bundleno = 1176 (0x498), region = 40  ;;  %p251_p3 = scmp.lt.s32.totalorder (!%p217_p2), %s982_s25, 3 }
   0x7   : > { %s1097_s11 = smov (!%p217_p2), 88   ;;  %s1098_s12 = smov (!%p217_p2), 96  }
   0x8   : > { %s1099_s13 = smov (!%p217_p2), 112   ;;  %s1100_s14 = smov (!%p217_p2), 80  }
   0x9   : > { %s1101_s15 = smov (!%p217_p2), 72   ;;  %s1102_s16 = smov (!%p217_p2), 104  }
   0xa   : > { %s1103_s17 = smov (!%p217_p2), 64   ;;  %s1104_s18 = smov (!%p217_p2), 56  }
   0xb   : > { %v1028_v0 = vld [vmem:[%s1301_s1 + $0x8] sm:$0xff]  ;;  %v1027_v1 = vld [vmem:[%s1301_s1] sm:$0xff]  ;;  %s1308_s25 = smov (!%p251_p3, %s982_s25), 3  ;;  %vm290_vm0 = vcmask 261120   ;;  %vm315_vm1 = vcmask 64512   ;;  %vm390_vm2 = vcmask 1043456  }
   0xc   : > { %300 = vmatpush.bf16.msra.mxu0 %v1028_v0  ;;  %s983_s28 = sshll.u32 %s1308_s25, 3  ;;  %v1054_v5 = vld [vmem:[%s1302_s2] ss:$0 sm:$0xff]  ;;  %s1105_s19 = smov 48   ;;  %vm430_vm3 = vcmask 60416   ;;  %vm557_vm4 = vcmask 126016  }
   0xd   : > { %s254_s7 = scalar_lea.vmem %s1300_s0, %s983_s28  ;;  %s1106_s20 = smov 40   ;;  %vm684_vm5 = vcmask 191616   ;;  %vm811_vm6 = vcmask 257216   ;;  %vm862_vm7 = vcmask 257024   ;;  %vm876_vm8 = vcmask 253952  }
   0xe   : > { %v1168_v2 = vld [vmem:[%s254_s7] sm:$0xff]  ;;  %v1170_v3 = vld [vmem:[%s254_s7 + $0x8] sm:$0xff]  ;;  %s1107_s23 = smov 8   ;;  %s1108_s24 = smov 16  }
   0xf   : > { %v269_v4 = vpack.c.bf16 %v1170_v3, %v1168_v2  ;;  %s1109_s26 = smov 24   ;;  %s985_s9 = sshll.u32 %s1308_s25, 2 }
  0x10   : > { %301 = vmatpush.bf16.msra.mxu0 %v1027_v1  ;;  %p262_p4 = scmp.lt.s32.totalorder %s1151_s22, 1 }
  0x12   : > { %s1310_s22 = smov (!%p262_p4, %s1151_s22), 1 }
  0x13   : > { %995 = vmatmul.msk.bf16.vlgmr.msra.gmra.mxu0 %vm290_vm0, %v269_v4  ;;  %s986_s25 = sshll.u32 %s1310_s22, 1 }
  0x90   : > { %v303_v6 = vpop.f32.mrf.mxu0 }
  0x91   : > { %v304_v7 = vadd.f32 %v1054_v5, %v303_v6 }
  0x93   : > { %v308_v8 = vpack.c.bf16 %v304_v7, %v304_v7 }
  0x95   : > { %v311_v9 = vunpack.c.l.b16 %v308_v8 }
  0x97   : > { %v1178_v10 = vpack.c.b16 %v311_v9, %v311_v9 }
  0x98   : > { %v305_v11 = vpop.f32.mrf.mxu0 }
  0x99   : > { %v306_v12 = vadd.f32 %v1054_v5, %v305_v11  ;;  %433 = vrot.lane.b32.xlu2 %v1178_v10, %s1096_s10  ;;  %435 = vrot.lane.b32.xlu1 %v1178_v10, %s1097_s11 }
  0x9a   : > { %313 = vrot.lane.b32.xlu0 %v1178_v10, %s1098_s12 }
  0x9b   : > { %v309_v13 = vpack.c.bf16 %v306_v12, %v306_v12 }
  0x9d   : > { %v336_v14 = vunpack.c.l.b16 %v309_v13 }
  0x9f   : > { %v1183_v15 = vpack.c.b16 %v336_v14, %v336_v14 }
  0xa1   : > { %456 = vrot.lane.b32.xlu2 %v1183_v15, %s1096_s10  ;;  %458 = vrot.lane.b32.xlu1 %v1183_v15, %s1097_s11 }
  0xa2   : > { %338 = vrot.lane.b32.xlu0 %v1183_v15, %s1098_s12  ;;  %s260_s12 = scalar_lea.vmem %s1305_s5, %s985_s9 }
  0xa9   : > { %560 = vrot.lane.b32.xlu2 %v1178_v10, %s1099_s13  ;;  %585 = vrot.lane.b32.xlu1 %v1183_v15, %s1100_s14 }
  0xaa   : > { %562 = vrot.lane.b32.xlu0 %v1178_v10, %s1100_s14 }
  0xb1   : > { %712 = vrot.lane.b32.xlu2 %v1183_v15, %s1101_s15  ;;  %689 = vrot.lane.b32.xlu1 %v1178_v10, %s1101_s15  ;;  %s265_s15 = scalar_lea.vmem %s1306_s6, %s986_s25 }
  0xb2   : > { %583 = vrot.lane.b32.xlu0 %v1183_v15, %s1099_s13 }
  0xb9   : > { %710 = vrot.lane.b32.xlu1 %v1183_v15, %s1102_s16 }
  0xba   : > { %687 = vrot.lane.b32.xlu0 %v1178_v10, %s1102_s16 }
  0xf3   : > { %v434_v16 = vpop.permute.xlu2 %433 }
  0xfb   : > { %v457_v21 = vpop.permute.xlu2 %456 }
 0x103   : > { %v561_v26 = vpop.permute.xlu2 %560 }
 0x10b   : > { %v436_v17 = vpop.permute.xlu1 %435  ;;  %v713_v31 = vpop.permute.xlu2 %712 }
 0x10c   : > { %v314_v18 = vpop.permute.xlu0 %313  ;;  %v441_v19 = vsel %vm315_vm1, %v436_v17, 0  ;;  %v718_v34 = vsel %vm315_vm1, %v713_v31, 0 }
 0x10d   : > { %v320_v20 = vsel %vm315_vm1, %v314_v18, 0  ;;  %450 = vmatpush.bf16.xpose.msrb.mxu0 %v441_v19 }
 0x10e   : > { %329 = vmatpush.bf16.xpose.msra.mxu1 %v320_v20 }
 0x113   : > { %v459_v22 = vpop.permute.xlu1 %458 }
 0x114   : > { %v339_v23 = vpop.permute.xlu0 %338  ;;  %1000 = vmatmul.msk.bf16.vlgmr.msrb.gmra.mxu0 %vm315_vm1, %v434_v16  ;;  %v464_v24 = vsel %vm315_vm1, %v459_v22, 0 }
 0x115   : > { %996 = vmatmul.msk.bf16.vlgmr.msra.gmra.mxu1 %vm315_vm1, %v308_v8  ;;  %v344_v25 = vsel %vm315_vm1, %v339_v23, 0 }
 0x116   : > { %353 = vmatpush.bf16.xpose.msra.mxu2 %v344_v25  ;;  %473 = vmatpush.bf16.xpose.msrb.mxu1 %v464_v24 }
 0x11b   : > { %v586_v27 = vpop.permute.xlu1 %585 }
 0x11c   : > { %v591_v28 = vsel %vm315_vm1, %v586_v27, 0  ;;  %v563_v29 = vpop.permute.xlu0 %562 }
 0x11d   : > { %v568_v30 = vsel %vm315_vm1, %v563_v29, 0  ;;  %997 = vmatmul.msk.bf16.vlgmr.msra.gmra.mxu2 %vm315_vm1, %v309_v13 }
 0x11e   : > { %600 = vmatpush.bf16.xpose.msra.mxu1 %v591_v28  ;;  %577 = vmatpush.bf16.xpose.msra.mxu0 %v568_v30 }
 0x123   : > { %v690_v32 = vpop.permute.xlu1 %689 }
 0x124   : > { %v695_v33 = vsel %vm315_vm1, %v690_v32, 0  ;;  %v584_v35 = vpop.permute.xlu0 %583 }
 0x125   : > { %1001 = vmatmul.msk.bf16.vlgmr.msrb.gmra.mxu1 %vm315_vm1, %v457_v21  ;;  %1004 = vmatmul.msk.bf16.vlgmr.msra.gmra.mxu0 %vm315_vm1, %v561_v26 }
 0x126   : > { %727 = vmatpush.bf16.xpose.msrb.mxu1 %v718_v34  ;;  %704 = vmatpush.bf16.xpose.msrb.mxu0 %v695_v33 }
 0x12b   : > { %v711_v37 = vpop.permute.xlu1 %710 }
 0x12c   : > { %v688_v36 = vpop.permute.xlu0 %687 }
 0x135   : > { %1005 = vmatmul.msk.bf16.vlgmr.msra.gmra.mxu1 %vm315_vm1, %v584_v35  ;;  %1008 = vmatmul.msk.bf16.vlgmr.msrb.gmra.mxu0 %vm315_vm1, %v688_v36 }
 0x145   : > { %1009 = vmatmul.msk.bf16.vlgmr.msrb.gmra.mxu1 %vm315_vm1, %v711_v37 }
 0x191   : > { %v452_v38 = vpop.f32.mrf.mxu0 }
 0x192   : > { %v331_v39 = vpop.f32.mrf.mxu1  ;;  %v479_v40 = vmul.f32 0.35355338, %v452_v38 }
 0x193   : > { %v359_v41 = vmul.f32 0.35355338, %v331_v39 }
 0x194   : > { %v481_v42 = vsel %vm315_vm1, %v479_v40, -inf }
 0x195   : > { %482 = vmax.xlane.f32.xlu1 %v481_v42  ;;  %v361_v43 = vsel %vm315_vm1, %v359_v41, -inf }
 0x196   : > { %362 = vmax.xlane.f32.xlu2 %v361_v43 }
 0x199   : > { %v454_v44 = vpop.f32.mrf.mxu0 }
 0x19a   : > { %v333_v45 = vpop.f32.mrf.mxu1 }
 0x1a0   : > { %v355_v46 = vpop.f32.mrf.mxu2 }
 0x1a1   : > { %v360_v47 = vmul.f32 0.35355338, %v355_v46 }
 0x1a2   : > { %v475_v48 = vpop.f32.mrf.mxu1  ;;  %v579_v49 = vpop.f32.mrf.mxu0 }
 0x1a3   : > { %v480_v50 = vmul.f32 0.35355338, %v475_v48  ;;  %v364_v51 = vsel %vm315_vm1, %v360_v47, -inf  ;;  %v606_v4 = vmul.f32 0.35355338, %v579_v49 }
 0x1a4   : > { %365 = vmax.xlane.f32.xlu0 %v364_v51 }
 0x1a5   : > { %v484_v52 = vsel %vm315_vm1, %v480_v50, -inf  ;;  %v608_v6 = vsel %vm315_vm1, %v606_v4, -inf }
 0x1a6   : > { %485 = vmax.xlane.f32.xlu2 %v484_v52 }
 0x1a8   : > { %v357_v53 = vpop.f32.mrf.mxu2 }
 0x1aa   : > { %v477_v54 = vpop.f32.mrf.mxu1  ;;  %v581_v55 = vpop.f32.mrf.mxu0 }
 0x1ae   : > { %407 = vrot.lane.b32.xlu1 %v1183_v15, %s1103_s17 }
 0x1b2   : > { %v602_v56 = vpop.f32.mrf.mxu1  ;;  %v706_v57 = vpop.f32.mrf.mxu0 }
 0x1b3   : > { %v607_v63 = vmul.f32 0.35355338, %v602_v56  ;;  %v733_v5 = vmul.f32 0.35355338, %v706_v57 }
 0x1b5   : > { %v611_v1 = vsel %vm315_vm1, %v607_v63, -inf  ;;  %v735_v7 = vsel %vm315_vm1, %v733_v5, -inf }
 0x1b6   : > { %526 = vrot.lane.b32.xlu1 %v1183_v15, %s1104_s18 }
 0x1b8   : > { %505 = vrot.lane.b32.xlu0 %v1178_v10, %s1104_s18 }
 0x1ba   : > { %v604_v58 = vpop.f32.mrf.mxu1  ;;  %v708_v59 = vpop.f32.mrf.mxu0 }
 0x1be   : > { %385 = vrot.lane.b32.xlu2 %v1178_v10, %s1103_s17 }
 0x1c2   : > { %v729_v60 = vpop.f32.mrf.mxu1 }
 0x1c3   : > { %v734_v62 = vmul.f32 0.35355338, %v729_v60 }
 0x1c5   : > { %v738_v0 = vsel %vm315_vm1, %v734_v62, -inf }
 0x1ca   : > { %v731_v61 = vpop.f32.mrf.mxu1 }
 0x1e0   : > { %739 = vmax.xlane.f32.xlu1 %v738_v0 }
 0x1e2   : > { %612 = vmax.xlane.f32.xlu0 %v611_v1 }
 0x1e7   : > { %609 = vmax.xlane.f32.xlu2 %v608_v6 }
 0x1ea   : > { %736 = vmax.xlane.f32.xlu0 %v735_v7 }
 0x208   : > { %v483_v8 = vpop.xlane.xlu1 %482 }
 0x209   : > { %v487_v9 = vsub.f32 %v479_v40, %v483_v8  ;;  %v363_v11 = vpop.xlane.xlu2 %362 }
 0x20a   : > { %v367_v12 = vsub.f32 %v359_v41, %v363_v11 }
 0x20b   : > { %v489_v13 = vmul.f32 1.442695, %v487_v9 }
 0x20c   : > { %v369_v14 = vmul.f32 1.442695, %v367_v12 }
 0x20d   : > { %1056 = vpow2.f32 %v489_v13 }
 0x20e   : > { %1058 = vpow2.f32 %v369_v14 }
 0x213   : > { %v1224_v16 = vpop.eup %1056 }
 0x214   : > { %v1226_v17 = vpop.eup %1058  ;;  %v493_v18 = vsel %vm315_vm1, %v1224_v16, 0.0 }
 0x215   : > { %v373_v19 = vsel %vm315_vm1, %v1226_v17, 0.0  ;;  %494 = vadd.xlane.f32.xlu0 %v493_v18 }
 0x216   : > { %374 = vadd.xlane.f32.xlu1 %v373_v19 }
 0x217   : > { %v366_v20 = vpop.xlane.xlu0 %365 }
 0x218   : > { %v368_v21 = vsub.f32 %v360_v47, %v366_v20 }
 0x219   : > { %v486_v22 = vpop.xlane.xlu2 %485 }
 0x21a   : > { %v371_v23 = vmul.f32 1.442695, %v368_v21  ;;  %v488_v24 = vsub.f32 %v480_v50, %v486_v22 }
 0x21c   : > { %1060 = vpow2.f32 %v371_v23  ;;  %v491_v25 = vmul.f32 1.442695, %v488_v24 }
 0x21e   : > { %1062 = vpow2.f32 %v491_v25 }
 0x220   : > { %v408_v26 = vpop.permute.xlu1 %407 }
 0x221   : > { %v386_v27 = vpop.permute.xlu2 %385  ;;  %v413_v28 = vsel %vm390_vm2, %v408_v26, 0 }
 0x222   : > { %v1233_v29 = vpop.eup %1060  ;;  %v392_v30 = vsel %vm390_vm2, %v386_v27, 0 }
 0x223   : > { %401 = vmatpush.bf16.msra.mxu3 %v392_v30  ;;  %v376_v31 = vsel %vm315_vm1, %v1233_v29, 0.0 }
 0x224   : > { %v1238_v32 = vpop.eup %1062  ;;  %377 = vadd.xlane.f32.xlu0 %v376_v31 }
 0x225   : > { %v496_v33 = vsel %vm315_vm1, %v1238_v32, 0.0 }
 0x226   : > { %497 = vadd.xlane.f32.xlu2 %v496_v33 }
 0x227   : > { %422 = vmatpush.bf16.msrb.mxu3 %v413_v28 }
 0x228   : > { %v527_v36 = vpop.permute.xlu1 %526 }
 0x229   : > { %v532_v1 = vsel %vm390_vm2, %v527_v36, 0 }
 0x22a   : > { %v506_v34 = vpop.permute.xlu0 %505 }
 0x22b   : > { %v511_v35 = vsel %vm390_vm2, %v506_v34, 0 }
 0x22c   : > { %520 = vmatpush.bf16.msrb.mxu2 %v511_v35 }
 0x22f   : > { %653 = vrot.lane.b32.xlu1 %v1183_v15, %s1105_s19 }
 0x23e   : > { %632 = vrot.lane.b32.xlu2 %v1178_v10, %s1105_s19 }
 0x253   : > { %v740_v37 = vpop.xlane.xlu1 %739 }
 0x254   : > { %v742_v38 = vsub.f32 %v734_v62, %v740_v37 }
 0x255   : > { %v613_v39 = vpop.xlane.xlu0 %612 }
 0x256   : > { %v615_v40 = vsub.f32 %v607_v63, %v613_v39  ;;  %v745_v42 = vmul.f32 1.442695, %v742_v38 }
 0x258   : > { %v618_v41 = vmul.f32 1.442695, %v615_v40 }
 0x25a   : > { %1064 = vpow2.f32 %v618_v41  ;;  %v610_v43 = vpop.xlane.xlu2 %609 }
 0x25b   : > { %v614_v44 = vsub.f32 %v606_v4, %v610_v43  ;;  %1066 = vpow2.f32 %v745_v42 }
 0x25d   : > { %v616_v45 = vmul.f32 1.442695, %v614_v44  ;;  %v737_v46 = vpop.xlane.xlu0 %736 }
 0x25e   : > { %v741_v47 = vsub.f32 %v733_v5, %v737_v46 }
 0x25f   : > { %1068 = vpow2.f32 %v616_v45 }
 0x260   : > { %v1065_v48 = vpop.eup %1064  ;;  %v743_v49 = vmul.f32 1.442695, %v741_v47 }
 0x261   : > { %v623_v50 = vsel %vm315_vm1, %v1065_v48, 0.0  ;;  %v1246_v51 = vpop.eup %1066 }
 0x262   : > { %1070 = vpow2.f32 %v743_v49  ;;  %624 = vadd.xlane.f32.xlu0 %v623_v50  ;;  %v750_v54 = vsel %vm315_vm1, %v1246_v51, 0.0 }
 0x265   : > { %v1069_v52 = vpop.eup %1068 }
 0x266   : > { %v620_v53 = vsel %vm315_vm1, %v1069_v52, 0.0 }
 0x267   : > { %621 = vadd.xlane.f32.xlu1 %v620_v53  ;;  %751 = vadd.xlane.f32.xlu2 %v750_v54 }
 0x268   : > { %v1071_v55 = vpop.eup %1070 }
 0x269   : > { %v747_v56 = vsel %vm315_vm1, %v1071_v55, 0.0 }
 0x26a   : > { %748 = vadd.xlane.f32.xlu0 %v747_v56 }
 0x27e   : > { %759 = vrot.lane.b32.xlu0 %v1178_v10, %s1106_s20 }
 0x280   : > { %780 = vrot.lane.b32.xlu1 %v1183_v15, %s1106_s20 }
 0x288   : > { %v495_v57 = vpop.xlane.xlu0 %494 }
 0x289   : > { %v375_v58 = vpop.xlane.xlu1 %374  ;;  %1072 = vrcp.f32 %v495_v57 }
 0x28a   : > { %1074 = vrcp.f32 %v375_v58 }
 0x28f   : > { %v1073_v59 = vpop.eup %1072 }
 0x290   : > { %v1075_v60 = vpop.eup %1074  ;;  %v501_v61 = vmul.f32 %v1073_v59, %v1224_v16 }
 0x291   : > { %v381_v62 = vmul.f32 %v1075_v60, %v1226_v17 }
 0x292   : > { %v503_v63 = vpack.c.bf16 %v501_v61, %v501_v61 }
 0x293   : > { %v383_v0 = vpack.c.bf16 %v381_v62, %v381_v62  ;;  %v1031_v62 = vld [vmem:[%s1303_s3 + $0x8] sm:$0xff] }
 0x294   : > { %1002 = vmatmul.msk.bf16.vlgmr.msrb.gmra.mxu2 %vm315_vm1, %v503_v63  ;;  %850 = vmatpush.bf16.msra.mxu0 %v1031_v62  ;;  %v1030_v63 = vld [vmem:[%s1303_s3] sm:$0xff] }
 0x295   : > { %998 = vmatmul.msk.bf16.vlgmr.msra.gmra.mxu3 %vm315_vm1, %v383_v0 }
 0x296   : > { %541 = vmatpush.bf16.msra.mxu3 %v532_v1 }
 0x297   : > { %v378_v10 = vpop.xlane.xlu0 %377 }
 0x298   : > { %1076 = vrcp.f32 %v378_v10  ;;  %851 = vmatpush.bf16.msra.mxu0 %v1030_v63 }
 0x299   : > { %v498_v15 = vpop.xlane.xlu2 %497 }
 0x29a   : > { %1078 = vrcp.f32 %v498_v15 }
 0x29e   : > { %v1077_v4 = vpop.eup %1076 }
 0x29f   : > { %v382_v5 = vmul.f32 %v1077_v4, %v1233_v29 }
 0x2a0   : > { %v1079_v12 = vpop.eup %1078 }
 0x2a1   : > { %v633_v6 = vpop.permute.xlu2 %632  ;;  %v654_v8 = vpop.permute.xlu1 %653  ;;  %v384_v9 = vpack.c.bf16 %v382_v5, %v382_v5  ;;  %v502_v13 = vmul.f32 %v1079_v12, %v1238_v32  ;;  %v1055_v5 = vld [vmem:[%s1304_s4] ss:$0 sm:$0xff] }
 0x2a2   : > { %v638_v7 = vsel %vm390_vm2, %v633_v6, 0  ;;  %v659_v11 = vsel %vm390_vm2, %v654_v8, 0 }
 0x2a3   : > { %647 = vmatpush.bf16.msra.mxu2 %v638_v7  ;;  %v504_v14 = vpack.c.bf16 %v502_v13, %v502_v13 }
 0x2a5   : > { %999 = vmatmul.msk.bf16.vlgmr.msrb.gmra.mxu3 %vm315_vm1, %v384_v9 }
 0x2a6   : > { %668 = vmatpush.bf16.msrb.mxu3 %v659_v11 }
 0x2b5   : > { %1003 = vmatmul.msk.bf16.vlgmr.msra.gmra.mxu3 %vm315_vm1, %v504_v14 }
 0x2d5   : > { %v625_v16 = vpop.xlane.xlu0 %624 }
 0x2d6   : > { %1080 = vrcp.f32 %v625_v16 }
 0x2da   : > { %v622_v17 = vpop.xlane.xlu1 %621  ;;  %v752_v23 = vpop.xlane.xlu2 %751 }
 0x2db   : > { %1082 = vrcp.f32 %v622_v17 }
 0x2dc   : > { %v1081_v18 = vpop.eup %1080  ;;  %1084 = vrcp.f32 %v752_v23 }
 0x2dd   : > { %v629_v19 = vmul.f32 %v1081_v18, %v1065_v48  ;;  %v749_v25 = vpop.xlane.xlu0 %748 }
 0x2de   : > { %1086 = vrcp.f32 %v749_v25 }
 0x2df   : > { %v631_v20 = vpack.c.bf16 %v629_v19, %v629_v19 }
 0x2e1   : > { %1007 = vmatmul.msk.bf16.vlgmr.msrb.gmra.mxu3 %vm315_vm1, %v631_v20  ;;  %v1083_v21 = vpop.eup %1082 }
 0x2e2   : > { %v628_v22 = vmul.f32 %v1083_v21, %v1069_v52  ;;  %v1085_v26 = vpop.eup %1084 }
 0x2e3   : > { %v756_v29 = vmul.f32 %v1085_v26, %v1246_v51 }
 0x2e4   : > { %v630_v24 = vpack.c.bf16 %v628_v22, %v628_v22  ;;  %v1087_v27 = vpop.eup %1086 }
 0x2e5   : > { %v755_v30 = vmul.f32 %v1087_v27, %v1071_v55  ;;  %v758_v34 = vpack.c.bf16 %v756_v29, %v756_v29 }
 0x2e6   : > { %1006 = vmatmul.msk.bf16.vlgmr.msra.gmra.mxu2 %vm315_vm1, %v630_v24 }
 0x2e7   : > { %v757_v35 = vpack.c.bf16 %v755_v30, %v755_v30 }
 0x2f0   : > { %v760_v28 = vpop.permute.xlu0 %759 }
 0x2f1   : > { %v765_v31 = vsel %vm390_vm2, %v760_v28, 0 }
 0x2f2   : > { %v781_v32 = vpop.permute.xlu1 %780  ;;  %774 = vmatpush.bf16.msrb.mxu2 %v765_v31 }
 0x2f3   : > { %v786_v33 = vsel %vm390_vm2, %v781_v32, 0 }
 0x2f4   : > { %795 = vmatpush.bf16.msra.mxu3 %v786_v33 }
 0x2f6   : > { %1010 = vmatmul.msk.bf16.vlgmr.msrb.gmra.mxu2 %vm315_vm1, %v757_v35 }
 0x2f7   : > { %1011 = vmatmul.msk.bf16.vlgmr.msra.gmra.mxu3 %vm315_vm1, %v758_v34 }
 0x317   : > { %v522_v36 = vpop.f32.mrf.mxu2 }
 0x318   : > { %v403_v37 = vpop.f32.mrf.mxu3  ;;  %v547_v38 = vpack.c.bf16 %v522_v36, %v522_v36 }
 0x319   : > { %v428_v39 = vpack.c.bf16 %v403_v37, %v403_v37 }
 0x31a   : > { %551 = vrot.lane.b32.xlu0 %v547_v38, %s1107_s23 }
 0x31b   : > { %431 = vst.msk [vmem:[#allocation2] sm:$0xf] %vm430_vm3, %v428_v39 }
 0x31f   : > { %v524_v40 = vpop.f32.mrf.mxu2 }
 0x320   : > { %v405_v41 = vpop.f32.mrf.mxu3 }
 0x328   : > { %v424_v42 = vpop.f32.mrf.mxu3 }
 0x329   : > { %v429_v43 = vpack.c.bf16 %v424_v42, %v424_v42 }
 0x32b   : > { %432 = vst.msk [vmem:[#allocation2 + $0x4] sm:$0xf] %vm430_vm3, %v429_v43 }
 0x330   : > { %v426_v44 = vpop.f32.mrf.mxu3 }
 0x338   : > { %v543_v45 = vpop.f32.mrf.mxu3 }
 0x339   : > { %v548_v46 = vpack.c.bf16 %v543_v45, %v543_v45 }
 0x33b   : > { %553 = vrot.lane.b32.xlu1 %v548_v46, %s1107_s23 }
 0x340   : > { %v545_v47 = vpop.f32.mrf.mxu3 }
 0x364   : > { %v670_v48 = vpop.f32.mrf.mxu3 }
 0x365   : > { %v675_v49 = vpack.c.bf16 %v670_v48, %v670_v48 }
 0x367   : > { %680 = vrot.lane.b32.xlu1 %v675_v49, %s1108_s24 }
 0x369   : > { %v649_v50 = vpop.f32.mrf.mxu2 }
 0x36a   : > { %v674_v51 = vpack.c.bf16 %v649_v50, %v649_v50 }
 0x36c   : > { %v672_v52 = vpop.f32.mrf.mxu3  ;;  %678 = vrot.lane.b32.xlu0 %v674_v51, %s1108_s24 }
 0x371   : > { %v651_v53 = vpop.f32.mrf.mxu2 }
 0x379   : > { %v776_v54 = vpop.f32.mrf.mxu2 }
 0x37a   : > { %v797_v55 = vpop.f32.mrf.mxu3  ;;  %v801_v56 = vpack.c.bf16 %v776_v54, %v776_v54 }
 0x37b   : > { %v802_v57 = vpack.c.bf16 %v797_v55, %v797_v55 }
 0x37c   : > { %805 = vrot.lane.b32.xlu2 %v801_v56, %s1109_s26 }
 0x37d   : > { %807 = vrot.lane.b32.xlu0 %v802_v57, %s1109_s26 }
 0x381   : > { %v778_v58 = vpop.f32.mrf.mxu2 }
 0x382   : > { %v799_v59 = vpop.f32.mrf.mxu3 }
 0x38c   : > { %v552_v60 = vpop.permute.xlu0 %551 }
 0x38d   : > { %558 = vst.msk [vmem:[#allocation2] sm:$0xf] %vm557_vm4, %v552_v60 }
 0x3ad   : > { %v554_v61 = vpop.permute.xlu1 %553 }
 0x3ae   : > { %559 = vst.msk [vmem:[#allocation2 + $0x4] sm:$0xf] %vm557_vm4, %v554_v61 }
 0x3d6   : > { %v806_v10 = vpop.permute.xlu2 %805 }
 0x3d9   : > { %v681_v0 = vpop.permute.xlu1 %680 }
 0x3da   : > { %686 = vst.msk [vmem:[#allocation2 + $0x4] sm:$0xf] %vm684_vm5, %v681_v0 }
 0x3de   : > { %v679_v1 = vpop.permute.xlu0 %678 }
 0x3df   : > { %685 = vst.msk [vmem:[#allocation2] sm:$0xf] %vm684_vm5, %v679_v1 }
 0x3e0   : > { %812 = vst.msk [vmem:[#allocation2] sm:$0xf] %vm811_vm6, %v806_v10 }
 0x3ef   : > { %v808_v15 = vpop.permute.xlu0 %807 }
 0x3f0   : > { %813 = vst.msk [vmem:[#allocation2 + $0x4] sm:$0xf] %vm811_vm6, %v808_v15 }
 0x3f7   : > { %v1029_v4 = vld [vmem:[#allocation2] sm:$0xff] }
 0x3f8   : > { %1024 = vmatmul.msk.bf16.vlgmr.msra.gmra.mxu0 %vm290_vm0, %v1029_v4 }
 0x475   : > { %v853_v6 = vpop.f32.mrf.mxu0 }
 0x476   : > { %v854_v7 = vadd.f32 %v1055_v5, %v853_v6 }
 0x478   : > { %v858_v8 = vadd.f32 %v854_v7, %v1168_v2 }
 0x47a   : > { %v860_v9 = vpack.c.bf16 %v858_v8, %v858_v8 }
 0x47c   : > { %863 = vst.msk [vmem:[%s260_s12] sm:$0xf] %vm862_vm7, %v860_v9  ;;  %v865_v13 = vunpack.c.l.bf16 %v860_v9 }
 0x47d   : > { %v855_v11 = vpop.f32.mrf.mxu0 }
 0x47e   : > { %v856_v12 = vadd.f32 %v1055_v5, %v855_v11  ;;  %v878_v17 = vmul.f32 %v865_v13, %v865_v13  ;;  %v867_v2 = vsel %vm290_vm0, %v865_v13, 0.0 }
 0x480   : > { %v859_v14 = vadd.f32 %v856_v12, %v1170_v3  ;;  %v880_v22 = vsel %vm290_vm0, %v878_v17, 0.0 }
 0x482   : > { %v861_v16 = vpack.c.bf16 %v859_v14, %v859_v14 }
 0x484   : > { %864 = vst.msk [vmem:[%s260_s12 + $0x4] sm:$0xf] %vm862_vm7, %v861_v16  ;;  %v866_v18 = vunpack.c.l.bf16 %v861_v16 }
 0x486   : > { %v868_v19 = vsel %vm290_vm0, %v866_v18, 0.0  ;;  %v879_v20 = vmul.f32 %v866_v18, %v866_v18 }
 0x487   : > { %v869_v21 = vadd.f32 %v868_v19, %v867_v2 }
 0x488   : > { %v881_v23 = vsel %vm290_vm0, %v879_v20, 0.0 }
 0x489   : > { %v870_v24 = vrot.slane %v869_v21, 4  ;;  %v882_v25 = vadd.f32 %v881_v23, %v880_v22 }
 0x48b   : > { %v871_v26 = vadd.f32 %v870_v24, %v869_v21  ;;  %v883_v3 = vrot.slane %v882_v25, 4 }
 0x48d   : > { %v872_v27 = vrot.slane %v871_v26, 2  ;;  %v884_v28 = vadd.f32 %v883_v3, %v882_v25 }
 0x48f   : > { %v873_v29 = vadd.f32 %v872_v27, %v871_v26  ;;  %v885_v30 = vrot.slane %v884_v28, 2 }
 0x491   : > { %v874_v31 = vrot.slane %v873_v29, 1  ;;  %v886_v32 = vadd.f32 %v885_v30, %v884_v28 }
 0x493   : > { %v875_v33 = vadd.f32 %v874_v31, %v873_v29  ;;  %v887_v34 = vrot.slane %v886_v32, 1 }
 0x495   : > { %877 = vst.msk [vmem:[%s265_s15] sm:$0x1] %vm876_vm8, %v875_v33  ;;  %v888_v35 = vadd.f32 %v887_v34, %v886_v32 }
 0x497   : > { %889 = vst.msk [vmem:[%s265_s15 + $0x1] sm:$0x1] %vm876_vm8, %v888_v35 }
 0x498 PF: > { %s17_s21 = sadd.s32 1, %s1094_s21  }
 0x499   : > { %p14_p5 = scmp.ge.s32.totalorder %s17_s21, 4  }
 0x49b   :  { %16 = sbr.rel (!%p14_p5) target bundleno = 1 (0x1), region = 82 }

</bundles_post_ra>
